<compile_context>
chip_gen: v6e
topology: v6e:2x2x1
jax: 0.10.0
libtpu: 0.0.40
codegen_flags: <defaults>
</compile_context>

<pallas_src>
import jax
import jax.numpy as jnp
from jax.experimental import pallas as pl
from jax.experimental.pallas import tpu as pltpu


LANE = 128                       # pad K and C_out to multiples of the lane width
_VMEM_BUDGET = 24 * 1024 * 1024  # per-call working-set target (fits v7x 32 MiB scoped)
_VMEM_LIMIT = 48 * 1024 * 1024   # explicit scoped-VMEM limit handed to Mosaic


def _round_up(x, m):
    return (x + m - 1) // m * m


# ---------------------------------------------------------------------------
# Pallas kernels
# ---------------------------------------------------------------------------
def conv_bn_lrelu_kernel(p_ref, w_ref, b_ref, o_ref):
    """out = leaky_relu( patches @ W_folded + bias , slope=0.2 )

    p: (tile_m, K) bf16, w: (K, C_pad) bf16 (BN scale pre-folded), b: (1, C_pad) f32.
    """
    acc = jnp.dot(p_ref[...], w_ref[...], preferred_element_type=jnp.float32)
    y = acc + b_ref[...]                       # f32 epilogue
    o_ref[...] = jnp.where(y > 0, y, 0.2 * y)  # LeakyReLU(0.2)


def linear_sigmoid_kernel(x_ref, w_ref, b_ref, o_ref):
    """out = sigmoid(x @ W + b) with lane-dense (padded) output columns."""
    logits = jnp.dot(x_ref[...], w_ref[...], preferred_element_type=jnp.float32)
    o_ref[...] = jax.nn.sigmoid(logits + b_ref[...])


# ---------------------------------------------------------------------------
# Pallas wrappers
# ---------------------------------------------------------------------------
def fused_conv_block(patches, w2d, bias):
    """patches: (M, K) bf16, w2d: (K, C_pad) bf16, bias: (1, C_pad) f32 -> (M, C_pad) f32.

    K and C_pad are multiples of 128. M is tiled with a VMEM-budgeted row tile.
    """
    M, K = patches.shape
    _, C = w2d.shape
    M8 = _round_up(M, 8)

    # Pick the largest row tile whose double-buffered working set fits the budget
    # (patches bf16 + weights bf16 + f32 output, x2 for pipelining).
    tile_m = 8
    for cand in (512, 256, 128, 64, 32, 16, 8):
        tm = min(cand, M8)
        working = 2 * (tm * K * 2 + K * C * 2 + tm * C * 4) + C * 4
        if working <= _VMEM_BUDGET:
            tile_m = tm
            break

    M_pad = _round_up(M, tile_m)
    if M_pad != M:
        patches = jnp.pad(patches, ((0, M_pad - M), (0, 0)))

    cost = pl.CostEstimate(
        flops=2 * M_pad * K * C,
        transcendentals=0,
        bytes_accessed=M_pad * K * 2 + K * C * 2 + M_pad * C * 4,
    )
    out = pl.pallas_call(
        conv_bn_lrelu_kernel,
        out_shape=jax.ShapeDtypeStruct((M_pad, C), jnp.float32),
        grid=(M_pad // tile_m,),
        in_specs=[
            pl.BlockSpec((tile_m, K), lambda i: (i, 0)),
            pl.BlockSpec((K, C), lambda i: (0, 0)),
            pl.BlockSpec((1, C), lambda i: (0, 0)),
        ],
        out_specs=pl.BlockSpec((tile_m, C), lambda i: (i, 0)),
        compiler_params=pltpu.CompilerParams(
            dimension_semantics=("parallel",),
            vmem_limit_bytes=_VMEM_LIMIT,
        ),
        cost_estimate=cost,
    )(patches, w2d, bias)
    return out[:M]


def fused_classifier(x, w, b):
    """x: (N, D) bf16, w: (D, O_pad) bf16, b: (1, O_pad) f32 -> (N, O_pad) f32."""
    N, D = x.shape
    _, O = w.shape
    N_pad = _round_up(N, 8)
    if N_pad != N:
        x = jnp.pad(x, ((0, N_pad - N), (0, 0)))
    tile_n = min(256, N_pad)

    cost = pl.CostEstimate(
        flops=2 * N_pad * D * O,
        transcendentals=N_pad * O,
        bytes_accessed=N_pad * D * 2 + D * O * 2 + N_pad * O * 4,
    )
    out = pl.pallas_call(
        linear_sigmoid_kernel,
        out_shape=jax.ShapeDtypeStruct((N_pad, O), jnp.float32),
        grid=(N_pad // tile_n,),
        in_specs=[
            pl.BlockSpec((tile_n, D), lambda i: (i, 0)),
            pl.BlockSpec((D, O), lambda i: (0, 0)),
            pl.BlockSpec((1, O), lambda i: (0, 0)),
        ],
        out_specs=pl.BlockSpec((tile_n, O), lambda i: (i, 0)),
        compiler_params=pltpu.CompilerParams(
            dimension_semantics=("parallel",),
            vmem_limit_bytes=_VMEM_LIMIT,
        ),
        cost_estimate=cost,
    )(x, w, b)
    return out[:N]


# ---------------------------------------------------------------------------
# Glue: NHWC im2col for Conv2d(kernel=3, stride=2, padding=1)
# ---------------------------------------------------------------------------
def im2col_k3s2p1_nhwc(x):
    """x: (N, H, W, C) -> patches (N*Ho*Wo, 9*C) ordered (kh, kw, c), plus (Ho, Wo)."""
    N, H, W, C = x.shape
    Ho = (H + 2 - 3) // 2 + 1
    Wo = (W + 2 - 3) // 2 + 1
    xp = jnp.pad(x, ((0, 0), (1, 1), (1, 1), (0, 0)))
    taps = []
    for kh in range(3):
        for kw in range(3):
            taps.append(xp[:, kh:kh + 2 * Ho:2, kw:kw + 2 * Wo:2, :])
    p = jnp.stack(taps, axis=3)                  # (N, Ho, Wo, 9, C)
    return p.reshape(N * Ho * Wo, 9 * C), Ho, Wo


# ---------------------------------------------------------------------------
# Parameters (PyTorch layout) + one-time kernel-ready prep
# ---------------------------------------------------------------------------
def init_params(key, img_size, hidden_dims):
    params = {"convs": []}
    in_ch = 1
    for h in hidden_dims:
        key, k1, k2 = jax.random.split(key, 3)
        w = jax.random.normal(k1, (h, in_ch, 3, 3), jnp.float32) * 0.05
        cb = jax.random.normal(k2, (h,), jnp.float32) * 0.01
        params["convs"].append(dict(
            w=w, b=cb,
            gamma=jnp.ones((h,), jnp.float32), beta=jnp.zeros((h,), jnp.float32),
            rmean=jnp.zeros((h,), jnp.float32), rvar=jnp.ones((h,), jnp.float32)))
        in_ch = h
    out_size = img_size // (2 ** len(hidden_dims))
    d = hidden_dims[-1] * out_size * out_size
    key, k1, k2 = jax.random.split(key, 3)
    params["fc_w"] = jax.random.normal(k1, (d, 1), jnp.float32) * 0.05
    params["fc_b"] = jax.random.normal(k2, (1, 1), jnp.float32) * 0.01
    return params


def prepare_kernel_params(params, img_size):
    """One-time transform: fold BN into weights, pad K/C_out to 128, cast to bf16,
    and permute the fc weight rows for NHWC(-padded) flatten order."""
    eps = 1e-5
    prepped = {"convs": []}
    c_in_pad = 1                      # channel count of the NHWC activation fed to each layer
    spatial = img_size
    for layer in params["convs"]:
        w, cb = layer["w"], layer["b"]
        gamma, beta = layer["gamma"], layer["beta"]
        rmean, rvar = layer["rmean"], layer["rvar"]
        c_out, c_in = w.shape[0], w.shape[1]
        c_out_pad = _round_up(c_out, LANE)

        # (C_out, C_in, kH, kW) -> (kH, kW, C_in, C_out); zero-pad the input-channel
        # axis to match the padded activation and the output axis to a lane multiple.
        w_t = jnp.transpose(w, (2, 3, 1, 0))
        w_t = jnp.pad(w_t, ((0, 0), (0, 0), (0, c_in_pad - c_in), (0, c_out_pad - c_out)))

        # Fold eval-mode BatchNorm + conv bias into per-channel scale/bias,
        # then fold the scale directly into the weights.
        inv_std = 1.0 / jnp.sqrt(rvar + eps)
        scale = jnp.pad(gamma * inv_std, (0, c_out_pad - c_out))
        bias = jnp.pad((cb - rmean) * gamma * inv_std + beta, (0, c_out_pad - c_out))

        k_dim = 9 * c_in_pad
        k_pad = _round_up(k_dim, LANE)
        w2d = w_t.reshape(k_dim, c_out_pad) * scale[None, :]
        w2d = jnp.pad(w2d, ((0, k_pad - k_dim), (0, 0)))      # zero rows for padded K

        prepped["convs"].append(dict(
            w2d=w2d.astype(jnp.bfloat16),
            bias=bias.reshape(1, c_out_pad).astype(jnp.float32),
            k_dim=k_dim, k_pad=k_pad, c_out_pad=c_out_pad))
        c_in_pad = c_out_pad
        spatial = (spatial + 1) // 2

    # Classifier: PyTorch flattens NCHW; our activation is NHWC with padded channels.
    c_last = params["convs"][-1]["w"].shape[0]
    c_last_pad = _round_up(c_last, LANE)
    ho = wo = spatial
    fc_w = params["fc_w"].reshape(c_last, ho, wo, 1)          # NCHW-flatten order
    fc_w = jnp.transpose(fc_w, (1, 2, 0, 3))                  # -> (Ho, Wo, C, 1)
    fc_w = jnp.pad(fc_w, ((0, 0), (0, 0), (0, c_last_pad - c_last), (0, 0)))
    fc_w = fc_w.reshape(ho * wo * c_last_pad, 1)
    fc_w = jnp.pad(fc_w, ((0, 0), (0, LANE - 1)))             # lane-dense (128-wide) output
    fc_b = jnp.pad(params["fc_b"], ((0, 0), (0, LANE - 1)))
    prepped["fc_w"] = fc_w.astype(jnp.bfloat16)
    prepped["fc_b"] = fc_b.astype(jnp.float32)
    return prepped


# ---------------------------------------------------------------------------
# Forward
# ---------------------------------------------------------------------------
def discriminator_forward(prepped, img):
    """img: (N, 1, H, W) float32 -> validity (N, 1) float32."""
    N = img.shape[0]
    x = jnp.transpose(img, (0, 2, 3, 1))                       # NCHW -> NHWC once
    for layer in prepped["convs"]:
        patches, Ho, Wo = im2col_k3s2p1_nhwc(x.astype(jnp.bfloat16))
        if layer["k_pad"] != layer["k_dim"]:
            patches = jnp.pad(patches, ((0, 0), (0, layer["k_pad"] - layer["k_dim"])))
        y = fused_conv_block(patches, layer["w2d"], layer["bias"])  # (M, C_pad) f32
        x = y.reshape(N, Ho, Wo, layer["c_out_pad"])                # stay NHWC, padded C
    flat = x.reshape(N, -1).astype(jnp.bfloat16)
    out = fused_classifier(flat, prepped["fc_w"], prepped["fc_b"])  # (N, 128)
    return out[:, :1]


# ---------------------------------------------------------------------------
if __name__ == "__main__":
    img_size = 16
    hidden_dims = [8, 16, 32]          # small config: 16 -> 8 -> 4 -> 2 spatial
    key = jax.random.PRNGKey(0)
    key, pkey, xkey = jax.random.split(key, 3)

    params = init_params(pkey, img_size, hidden_dims)
    prepped = prepare_kernel_params(params, img_size)
    img = jax.random.normal(xkey, (2, 1, img_size, img_size), jnp.float32)

    fwd = jax.jit(lambda im: discriminator_forward(prepped, im))
    validity = fwd(img)
    jax.block_until_ready(validity)
    assert validity.shape == (2, 1)
    assert bool(jnp.all((validity >= 0.0) & (validity <= 1.0)))
    print("KERNEL_OK")
</pallas_src>

<mosaic_0001>
module attributes {stable_mosaic.version = 11 : i64} {
  func.func @conv_bn_lrelu_kernel(%arg0: i32, %arg1: memref<128x128xbf16, #tpu.memory_space<vmem>>, %arg2: memref<128x128xbf16, #tpu.memory_space<vmem>>, %arg3: memref<1x128xf32, #tpu.memory_space<vmem>>, %arg4: memref<128x128xf32, #tpu.memory_space<vmem>>) attributes {dimension_semantics = [#tpu.dimension_semantics<parallel>], iteration_bounds = array<i64: 1>, scalar_prefetch = 0 : i64, scratch_operands = 0 : i64, tpu.core_type = #tpu.core_type<tc>, window_params = [{transform_indices = @transform_0, window_bounds = array<i64: 128, 128>}, {pipeline_mode = #tpu.pipeline_mode<synchronous>, transform_indices = @transform_1, window_bounds = array<i64: 128, 128>}, {pipeline_mode = #tpu.pipeline_mode<synchronous>, transform_indices = @transform_2, window_bounds = array<i64: 1, 128>}, {transform_indices = @transform_3, window_bounds = array<i64: 128, 128>}]} {
    %c0 = arith.constant 0 : index
    %c0_0 = arith.constant 0 : index
    %0 = vector.load %arg1[%c0, %c0_0] : memref<128x128xbf16, #tpu.memory_space<vmem>>, vector<128x128xbf16>
    %c0_1 = arith.constant 0 : index
    %c0_2 = arith.constant 0 : index
    %1 = vector.load %arg2[%c0_1, %c0_2] : memref<128x128xbf16, #tpu.memory_space<vmem>>, vector<128x128xbf16>
    %cst = arith.constant dense<0.000000e+00> : vector<128x128xf32>
    %2 = tpu.matmul %0, %1, %cst {dimension_numbers = #tpu.dot_dimension_numbers<[1], [0], [0], [1], [0, 0, 1, 1], [], []>} : vector<128x128xbf16>, vector<128x128xbf16>, vector<128x128xf32> -> vector<128x128xf32>
    %c0_3 = arith.constant 0 : index
    %c0_4 = arith.constant 0 : index
    %3 = vector.load %arg3[%c0_3, %c0_4] : memref<1x128xf32, #tpu.memory_space<vmem>>, vector<1x128xf32>
    %4 = vector.broadcast %3 : vector<1x128xf32> to vector<128x128xf32>
    %5 = arith.addf %2, %4 : vector<128x128xf32>
    %cst_5 = arith.constant 0.000000e+00 : f32
    %6 = vector.broadcast %cst_5 : f32 to vector<128x128xf32>
    %7 = arith.cmpf ogt, %5, %6 : vector<128x128xf32>
    %cst_6 = arith.constant 2.000000e-01 : f32
    %8 = vector.broadcast %cst_6 : f32 to vector<128x128xf32>
    %9 = arith.mulf %8, %5 : vector<128x128xf32>
    %10 = arith.select %7, %5, %9 : vector<128x128xi1>, vector<128x128xf32>
    %c0_7 = arith.constant 0 : index
    %c0_8 = arith.constant 0 : index
    %11 = vector.load %arg4[%c0_7, %c0_8] : memref<128x128xf32, #tpu.memory_space<vmem>>, vector<128x128xf32>
    tpu.vector_store %arg4[%c0_7, %c0_8], %10 {strides = array<i32>} : memref<128x128xf32, #tpu.memory_space<vmem>>, vector<128x128xf32>,
    return
  }
  func.func @transform_0(%arg0: i32) -> (i32, i32) {
    %c0_i32 = arith.constant 0 : i32
    %c0_i32_0 = arith.constant 0 : i32
    return %arg0, %c0_i32 : i32, i32
  }
  func.func @transform_1(%arg0: i32) -> (i32, i32) {
    %c0_i32 = arith.constant 0 : i32
    %c0_i32_0 = arith.constant 0 : i32
    %c0_i32_1 = arith.constant 0 : i32
    return %c0_i32, %c0_i32_0 : i32, i32
  }
  func.func @transform_2(%arg0: i32) -> (i32, i32) {
    %c0_i32 = arith.constant 0 : i32
    %c0_i32_0 = arith.constant 0 : i32
    %c0_i32_1 = arith.constant 0 : i32
    return %c0_i32, %c0_i32_0 : i32, i32
  }
  func.func @transform_3(%arg0: i32) -> (i32, i32) {
    %c0_i32 = arith.constant 0 : i32
    %c0_i32_0 = arith.constant 0 : i32
    return %arg0, %c0_i32 : i32, i32
  }
}

module attributes {stable_mosaic.version = 11 : i64} {
  func.func @conv_bn_lrelu_kernel(%arg0: i32, %arg1: memref<32x1152xbf16, #tpu.memory_space<vmem>>, %arg2: memref<1152x128xbf16, #tpu.memory_space<vmem>>, %arg3: memref<1x128xf32, #tpu.memory_space<vmem>>, %arg4: memref<32x128xf32, #tpu.memory_space<vmem>>) attributes {dimension_semantics = [#tpu.dimension_semantics<parallel>], iteration_bounds = array<i64: 1>, scalar_prefetch = 0 : i64, scratch_operands = 0 : i64, tpu.core_type = #tpu.core_type<tc>, window_params = [{transform_indices = @transform_0, window_bounds = array<i64: 32, 1152>}, {pipeline_mode = #tpu.pipeline_mode<synchronous>, transform_indices = @transform_1, window_bounds = array<i64: 1152, 128>}, {pipeline_mode = #tpu.pipeline_mode<synchronous>, transform_indices = @transform_2, window_bounds = array<i64: 1, 128>}, {transform_indices = @transform_3, window_bounds = array<i64: 32, 128>}]} {
    %c0 = arith.constant 0 : index
    %c0_0 = arith.constant 0 : index
    %0 = vector.load %arg1[%c0, %c0_0] : memref<32x1152xbf16, #tpu.memory_space<vmem>>, vector<32x1152xbf16>
    %c0_1 = arith.constant 0 : index
    %c0_2 = arith.constant 0 : index
    %1 = vector.load %arg2[%c0_1, %c0_2] : memref<1152x128xbf16, #tpu.memory_space<vmem>>, vector<1152x128xbf16>
    %cst = arith.constant dense<0.000000e+00> : vector<32x128xf32>
    %2 = tpu.matmul %0, %1, %cst {dimension_numbers = #tpu.dot_dimension_numbers<[1], [0], [0], [1], [0, 0, 1, 1], [], []>} : vector<32x1152xbf16>, vector<1152x128xbf16>, vector<32x128xf32> -> vector<32x128xf32>
    %c0_3 = arith.constant 0 : index
    %c0_4 = arith.constant 0 : index
    %3 = vector.load %arg3[%c0_3, %c0_4] : memref<1x128xf32, #tpu.memory_space<vmem>>, vector<1x128xf32>
    %4 = vector.broadcast %3 : vector<1x128xf32> to vector<32x128xf32>
    %5 = arith.addf %2, %4 : vector<32x128xf32>
    %cst_5 = arith.constant 0.000000e+00 : f32
    %6 = vector.broadcast %cst_5 : f32 to vector<32x128xf32>
    %7 = arith.cmpf ogt, %5, %6 : vector<32x128xf32>
    %cst_6 = arith.constant 2.000000e-01 : f32
    %8 = vector.broadcast %cst_6 : f32 to vector<32x128xf32>
    %9 = arith.mulf %8, %5 : vector<32x128xf32>
    %10 = arith.select %7, %5, %9 : vector<32x128xi1>, vector<32x128xf32>
    %c0_7 = arith.constant 0 : index
    %c0_8 = arith.constant 0 : index
    %11 = vector.load %arg4[%c0_7, %c0_8] : memref<32x128xf32, #tpu.memory_space<vmem>>, vector<32x128xf32>
    tpu.vector_store %arg4[%c0_7, %c0_8], %10 {strides = array<i32>} : memref<32x128xf32, #tpu.memory_space<vmem>>, vector<32x128xf32>,
    return
  }
  func.func @transform_0(%arg0: i32) -> (i32, i32) {
    %c0_i32 = arith.constant 0 : i32
    %c0_i32_0 = arith.constant 0 : i32
    return %arg0, %c0_i32 : i32, i32
  }
  func.func @transform_1(%arg0: i32) -> (i32, i32) {
    %c0_i32 = arith.constant 0 : i32
    %c0_i32_0 = arith.constant 0 : i32
    %c0_i32_1 = arith.constant 0 : i32
    return %c0_i32, %c0_i32_0 : i32, i32
  }
  func.func @transform_2(%arg0: i32) -> (i32, i32) {
    %c0_i32 = arith.constant 0 : i32
    %c0_i32_0 = arith.constant 0 : i32
    %c0_i32_1 = arith.constant 0 : i32
    return %c0_i32, %c0_i32_0 : i32, i32
  }
  func.func @transform_3(%arg0: i32) -> (i32, i32) {
    %c0_i32 = arith.constant 0 : i32
    %c0_i32_0 = arith.constant 0 : i32
    return %arg0, %c0_i32 : i32, i32
  }
}

module attributes {stable_mosaic.version = 11 : i64} {
  func.func @conv_bn_lrelu_kernel(%arg0: i32, %arg1: memref<8x1152xbf16, #tpu.memory_space<vmem>>, %arg2: memref<1152x128xbf16, #tpu.memory_space<vmem>>, %arg3: memref<1x128xf32, #tpu.memory_space<vmem>>, %arg4: memref<8x128xf32, #tpu.memory_space<vmem>>) attributes {dimension_semantics = [#tpu.dimension_semantics<parallel>], iteration_bounds = array<i64: 1>, scalar_prefetch = 0 : i64, scratch_operands = 0 : i64, tpu.core_type = #tpu.core_type<tc>, window_params = [{transform_indices = @transform_0, window_bounds = array<i64: 8, 1152>}, {pipeline_mode = #tpu.pipeline_mode<synchronous>, transform_indices = @transform_1, window_bounds = array<i64: 1152, 128>}, {pipeline_mode = #tpu.pipeline_mode<synchronous>, transform_indices = @transform_2, window_bounds = array<i64: 1, 128>}, {transform_indices = @transform_3, window_bounds = array<i64: 8, 128>}]} {
    %c0 = arith.constant 0 : index
    %c0_0 = arith.constant 0 : index
    %0 = vector.load %arg1[%c0, %c0_0] : memref<8x1152xbf16, #tpu.memory_space<vmem>>, vector<8x1152xbf16>
    %c0_1 = arith.constant 0 : index
    %c0_2 = arith.constant 0 : index
    %1 = vector.load %arg2[%c0_1, %c0_2] : memref<1152x128xbf16, #tpu.memory_space<vmem>>, vector<1152x128xbf16>
    %cst = arith.constant dense<0.000000e+00> : vector<8x128xf32>
    %2 = tpu.matmul %0, %1, %cst {dimension_numbers = #tpu.dot_dimension_numbers<[1], [0], [0], [1], [0, 0, 1, 1], [], []>} : vector<8x1152xbf16>, vector<1152x128xbf16>, vector<8x128xf32> -> vector<8x128xf32>
    %c0_3 = arith.constant 0 : index
    %c0_4 = arith.constant 0 : index
    %3 = vector.load %arg3[%c0_3, %c0_4] : memref<1x128xf32, #tpu.memory_space<vmem>>, vector<1x128xf32>
    %4 = vector.broadcast %3 : vector<1x128xf32> to vector<8x128xf32>
    %5 = arith.addf %2, %4 : vector<8x128xf32>
    %cst_5 = arith.constant 0.000000e+00 : f32
    %6 = vector.broadcast %cst_5 : f32 to vector<8x128xf32>
    %7 = arith.cmpf ogt, %5, %6 : vector<8x128xf32>
    %cst_6 = arith.constant 2.000000e-01 : f32
    %8 = vector.broadcast %cst_6 : f32 to vector<8x128xf32>
    %9 = arith.mulf %8, %5 : vector<8x128xf32>
    %10 = arith.select %7, %5, %9 : vector<8x128xi1>, vector<8x128xf32>
    %c0_7 = arith.constant 0 : index
    %c0_8 = arith.constant 0 : index
    %11 = vector.load %arg4[%c0_7, %c0_8] : memref<8x128xf32, #tpu.memory_space<vmem>>, vector<8x128xf32>
    tpu.vector_store %arg4[%c0_7, %c0_8], %10 {strides = array<i32>} : memref<8x128xf32, #tpu.memory_space<vmem>>, vector<8x128xf32>,
    return
  }
  func.func @transform_0(%arg0: i32) -> (i32, i32) {
    %c0_i32 = arith.constant 0 : i32
    %c0_i32_0 = arith.constant 0 : i32
    return %arg0, %c0_i32 : i32, i32
  }
  func.func @transform_1(%arg0: i32) -> (i32, i32) {
    %c0_i32 = arith.constant 0 : i32
    %c0_i32_0 = arith.constant 0 : i32
    %c0_i32_1 = arith.constant 0 : i32
    return %c0_i32, %c0_i32_0 : i32, i32
  }
  func.func @transform_2(%arg0: i32) -> (i32, i32) {
    %c0_i32 = arith.constant 0 : i32
    %c0_i32_0 = arith.constant 0 : i32
    %c0_i32_1 = arith.constant 0 : i32
    return %c0_i32, %c0_i32_0 : i32, i32
  }
  func.func @transform_3(%arg0: i32) -> (i32, i32) {
    %c0_i32 = arith.constant 0 : i32
    %c0_i32_0 = arith.constant 0 : i32
    return %arg0, %c0_i32 : i32, i32
  }
}

module attributes {stable_mosaic.version = 11 : i64} {
  func.func @linear_sigmoid_kernel(%arg0: i32, %arg1: memref<8x512xbf16, #tpu.memory_space<vmem>>, %arg2: memref<512x128xbf16, #tpu.memory_space<vmem>>, %arg3: memref<1x128xf32, #tpu.memory_space<vmem>>, %arg4: memref<8x128xf32, #tpu.memory_space<vmem>>) attributes {dimension_semantics = [#tpu.dimension_semantics<parallel>], iteration_bounds = array<i64: 1>, scalar_prefetch = 0 : i64, scratch_operands = 0 : i64, tpu.core_type = #tpu.core_type<tc>, window_params = [{transform_indices = @transform_0, window_bounds = array<i64: 8, 512>}, {pipeline_mode = #tpu.pipeline_mode<synchronous>, transform_indices = @transform_1, window_bounds = array<i64: 512, 128>}, {pipeline_mode = #tpu.pipeline_mode<synchronous>, transform_indices = @transform_2, window_bounds = array<i64: 1, 128>}, {transform_indices = @transform_3, window_bounds = array<i64: 8, 128>}]} {
    %c0 = arith.constant 0 : index
    %c0_0 = arith.constant 0 : index
    %0 = vector.load %arg1[%c0, %c0_0] : memref<8x512xbf16, #tpu.memory_space<vmem>>, vector<8x512xbf16>
    %c0_1 = arith.constant 0 : index
    %c0_2 = arith.constant 0 : index
    %1 = vector.load %arg2[%c0_1, %c0_2] : memref<512x128xbf16, #tpu.memory_space<vmem>>, vector<512x128xbf16>
    %cst = arith.constant dense<0.000000e+00> : vector<8x128xf32>
    %2 = tpu.matmul %0, %1, %cst {dimension_numbers = #tpu.dot_dimension_numbers<[1], [0], [0], [1], [0, 0, 1, 1], [], []>} : vector<8x512xbf16>, vector<512x128xbf16>, vector<8x128xf32> -> vector<8x128xf32>
    %c0_3 = arith.constant 0 : index
    %c0_4 = arith.constant 0 : index
    %3 = vector.load %arg3[%c0_3, %c0_4] : memref<1x128xf32, #tpu.memory_space<vmem>>, vector<1x128xf32>
    %4 = vector.broadcast %3 : vector<1x128xf32> to vector<8x128xf32>
    %5 = arith.addf %2, %4 : vector<8x128xf32>
    %6 = arith.negf %5 : vector<8x128xf32>
    %7 = math.exp %6 : vector<8x128xf32>
    %cst_5 = arith.constant 1.000000e+00 : f32
    %8 = vector.broadcast %cst_5 : f32 to vector<8x128xf32>
    %9 = arith.addf %8, %7 : vector<8x128xf32>
    %10 = arith.divf %8, %9 : vector<8x128xf32>
    %c0_6 = arith.constant 0 : index
    %c0_7 = arith.constant 0 : index
    %11 = vector.load %arg4[%c0_6, %c0_7] : memref<8x128xf32, #tpu.memory_space<vmem>>, vector<8x128xf32>
    tpu.vector_store %arg4[%c0_6, %c0_7], %10 {strides = array<i32>} : memref<8x128xf32, #tpu.memory_space<vmem>>, vector<8x128xf32>,
    return
  }
  func.func @transform_0(%arg0: i32) -> (i32, i32) {
    %c0_i32 = arith.constant 0 : i32
    %c0_i32_0 = arith.constant 0 : i32
    return %arg0, %c0_i32 : i32, i32
  }
  func.func @transform_1(%arg0: i32) -> (i32, i32) {
    %c0_i32 = arith.constant 0 : i32
    %c0_i32_0 = arith.constant 0 : i32
    %c0_i32_1 = arith.constant 0 : i32
    return %c0_i32, %c0_i32_0 : i32, i32
  }
  func.func @transform_2(%arg0: i32) -> (i32, i32) {
    %c0_i32 = arith.constant 0 : i32
    %c0_i32_0 = arith.constant 0 : i32
    %c0_i32_1 = arith.constant 0 : i32
    return %c0_i32, %c0_i32_0 : i32, i32
  }
  func.func @transform_3(%arg0: i32) -> (i32, i32) {
    %c0_i32 = arith.constant 0 : i32
    %c0_i32_0 = arith.constant 0 : i32
    return %arg0, %c0_i32 : i32, i32
  }
}

</mosaic_0001>

<bundles_post_ra>
// kernel: _lambda_.4
= control target key start
LH: loop header
LB: loop body
LE: loop exit
PB: predicated region body
PF: predicated region fallthrough
CT: control target
= control target key end

     0   :  { %s549_s1 = inlined_call_operand.vmem [shape: bf16[128,128], index: 1, kind: input, shape index: {}]   ;;  %s550_s0 = inlined_call_operand.vmem [shape: bf16[128,128], index: 0, kind: input, shape index: {}]   ;;  %s551_s2 = inlined_call_operand.vmem [shape: f32[1,128], index: 2, kind: input, shape index: {}]   ;;  %s552_s3 = inlined_call_operand.vmem [shape: f32[128,128], index: 3, kind: output, shape index: {}]  }
   0x1   :  { %v396_v0 = vld [vmem:[%s549_s1 + $0x38] sm:$0xff]   ;;  %v397_v1 = vld [vmem:[%s549_s1 + $0x30] sm:$0xff]   ;;  %v398_v2 = vld [vmem:[%s549_s1 + $0x28] sm:$0xff]  }
   0x2   :  { %348 = vmatprep.subr.bf16.mxu0 %v396_v0  ;;  %380 = vmatprep.subr.bf16.mxu1 %v396_v0  ;;  %v399_v3 = vld [vmem:[%s549_s1 + $0x20] sm:$0xff]   ;;  %v400_v6 = vld [vmem:[%s549_s1 + $0x18] sm:$0xff]   ;;  %v401_v7 = vld [vmem:[%s549_s1 + $0x10] sm:$0xff]  }
   0x3   :  { %349 = vmatpush3.bf16.msra.mxu0 %v396_v0  ;;  %388 = vmatpush3.bf16.msra.mxu1 %v396_v0  ;;  %v404_v4 = vld [vmem:[%s550_s0] sm:$0xff]   ;;  %v402_v8 = vld [vmem:[%s549_s1 + $0x8] sm:$0xff]   ;;  %v408_v12 = vld [vmem:[%s550_s0 + $0x10] sm:$0xff]  }
   0x4   :  { %350 = vmatprep.subr.bf16.mxu0 %v397_v1  ;;  %381 = vmatprep.subr.bf16.mxu1 %v397_v1  ;;  %v405_v5 = vld [vmem:[%s550_s0 + $0x20] sm:$0xff]   ;;  %v406_v10 = vld [vmem:[%s550_s0 + $0x8] sm:$0xff]   ;;  %v409_v13 = vld [vmem:[%s550_s0 + $0x30] sm:$0xff]  }
   0x5   :  { %364 = vmatprep.mubr.bf16.mxu0 %v404_v4  ;;  %372 = vmatprep.mubr.bf16.mxu1 %v405_v5  ;;  %v403_v9 = vld [vmem:[%s549_s1] sm:$0xff]   ;;  %v407_v11 = vld [vmem:[%s550_s0 + $0x28] sm:$0xff]   ;;  %v410_v14 = vld [vmem:[%s550_s0 + $0x18] sm:$0xff]  }
   0x6   :  { %v411_v15 = vld [vmem:[%s550_s0 + $0x38] sm:$0xff]   ;;  %v483_v16 = vld [vmem:[%s551_s2] ss:$0 sm:$0xff] }
   0x7   :  { %351 = vmatpush3.bf16.msra.mxu0 %v397_v1  ;;  %389 = vmatpush3.bf16.msra.mxu1 %v397_v1 }
   0x8   :  { %352 = vmatprep.subr.bf16.mxu0 %v398_v2  ;;  %382 = vmatprep.subr.bf16.mxu1 %v398_v2 }
   0xb   :  { %353 = vmatpush3.bf16.msra.mxu0 %v398_v2  ;;  %390 = vmatpush3.bf16.msra.mxu1 %v398_v2 }
   0xc   :  { %354 = vmatprep.subr.bf16.mxu0 %v399_v3  ;;  %383 = vmatprep.subr.bf16.mxu1 %v399_v3 }
   0xf   :  { %355 = vmatpush3.bf16.msra.mxu0 %v399_v3  ;;  %391 = vmatpush3.bf16.msra.mxu1 %v399_v3 }
  0x10   :  { %356 = vmatprep.subr.bf16.mxu0 %v400_v6  ;;  %384 = vmatprep.subr.bf16.mxu1 %v400_v6 }
  0x13   :  { %357 = vmatpush3.bf16.msra.mxu0 %v400_v6  ;;  %392 = vmatpush3.bf16.msra.mxu1 %v400_v6 }
  0x14   :  { %358 = vmatprep.subr.bf16.mxu0 %v401_v7  ;;  %385 = vmatprep.subr.bf16.mxu1 %v401_v7 }
  0x17   :  { %359 = vmatpush3.bf16.msra.mxu0 %v401_v7  ;;  %393 = vmatpush3.bf16.msra.mxu1 %v401_v7 }
  0x18   :  { %360 = vmatprep.subr.bf16.mxu0 %v402_v8  ;;  %386 = vmatprep.subr.bf16.mxu1 %v402_v8 }
  0x1b   :  { %361 = vmatpush3.bf16.msra.mxu0 %v402_v8  ;;  %394 = vmatpush3.bf16.msra.mxu1 %v402_v8 }
  0x1c   :  { %362 = vmatprep.subr.bf16.mxu0 %v403_v9  ;;  %387 = vmatprep.subr.bf16.mxu1 %v403_v9 }
  0x1f   :  { %363 = vmatpush3.bf16.msra.mxu0 %v403_v9  ;;  %395 = vmatpush3.bf16.msra.mxu1 %v403_v9 }
  0x22   :  { %365 = vmatmul.mubr.bf16.vlgmr.msra.gmra.mxu0 %v406_v10  ;;  %373 = vmatmul.mubr.bf16.vlgmr.msra.gmra.mxu1 %v407_v11 }
  0x23   :  { %368 = vmatprep.mubr.bf16.mxu0 %v408_v12  ;;  %376 = vmatprep.mubr.bf16.mxu1 %v409_v13 }
  0x2a   :  { %369 = vmatmul.mubr.bf16.gmra.mxu0 %v410_v14  ;;  %377 = vmatmul.mubr.bf16.gmra.mxu1 %v411_v15 }
  0xe2   :  { %v366_v17 = vpop.f32.mrf.mxu0  ;;  %v374_v18 = vpop.f32.mrf.mxu1 }
  0xe3   :  { %v193_v19 = vadd.f32 %v366_v17, %v483_v16  ;;  %v225_v20 = vadd.f32 %v374_v18, %v483_v16 }
  0xe4   :  { %v184_v21 = vpop.f32.mrf.mxu0  ;;  %v216_v22 = vpop.f32.mrf.mxu1 }
  0xe5   :  { %vm249_vm0 = vcmp.gt.f32.partialorder %v193_v19, 0.0  ;;  %v265_v23 = vmul.f32 0.2, %v193_v19  ;;  %vm257_vm1 = vcmp.gt.f32.partialorder %v225_v20, 0.0  ;;  %v273_v24 = vmul.f32 0.2, %v225_v20 }
  0xe6   :  { %v185_v25 = vadd.f32 %v483_v16, %v184_v21  ;;  %v217_v26 = vadd.f32 %v483_v16, %v216_v22  ;;  %v367_v27 = vpop.f32.mrf.mxu0  ;;  %v375_v28 = vpop.f32.mrf.mxu1 }
  0xe7   :  { %v281_v29 = vsel %vm249_vm0, %v193_v19, %v265_v23  ;;  %v289_v30 = vsel %vm257_vm1, %v225_v20, %v273_v24  ;;  %v196_v31 = vadd.f32 %v367_v27, %v483_v16  ;;  %v228_v32 = vadd.f32 %v375_v28, %v483_v16 }
  0xe8   :  { %297 = vst [vmem:[%s552_s3 + $0x10] sm:$0xff] %v281_v29  ;;  %305 = vst [vmem:[%s552_s3 + $0x50] sm:$0xff] %v289_v30  ;;  %vm247_vm2 = vcmp.gt.f32.partialorder %v185_v25, 0.0  ;;  %v263_v33 = vmul.f32 0.2, %v185_v25  ;;  %vm255_vm3 = vcmp.gt.f32.partialorder %v217_v26, 0.0  ;;  %v187_v35 = vpop.f32.mrf.mxu0  ;;  %v219_v36 = vpop.f32.mrf.mxu1 }
  0xe9   :  { %v271_v34 = vmul.f32 0.2, %v217_v26  ;;  %vm250_vm4 = vcmp.gt.f32.partialorder %v196_v31, 0.0  ;;  %v266_v37 = vmul.f32 0.2, %v196_v31  ;;  %vm258_vm5 = vcmp.gt.f32.partialorder %v228_v32, 0.0 }
  0xea   :  { %v274_v38 = vmul.f32 0.2, %v228_v32  ;;  %v279_v39 = vsel %vm247_vm2, %v185_v25, %v263_v33  ;;  %v188_v41 = vadd.f32 %v483_v16, %v187_v35  ;;  %v220_v42 = vadd.f32 %v483_v16, %v219_v36  ;;  %v370_v43 = vpop.f32.mrf.mxu0  ;;  %v378_v44 = vpop.f32.mrf.mxu1 }
  0xeb   :  { %v287_v40 = vsel %vm255_vm3, %v217_v26, %v271_v34  ;;  %295 = vst [vmem:[%s552_s3] sm:$0xff] %v279_v39  ;;  %v282_v45 = vsel %vm250_vm4, %v196_v31, %v266_v37  ;;  %v209_v47 = vadd.f32 %v370_v43, %v483_v16  ;;  %v241_v48 = vadd.f32 %v378_v44, %v483_v16 }
  0xec   :  { %303 = vst [vmem:[%s552_s3 + $0x40] sm:$0xff] %v287_v40  ;;  %v290_v46 = vsel %vm258_vm5, %v228_v32, %v274_v38  ;;  %298 = vst [vmem:[%s552_s3 + $0x18] sm:$0xff] %v282_v45  ;;  %vm248_vm6 = vcmp.gt.f32.partialorder %v188_v41, 0.0  ;;  %v264_v49 = vmul.f32 0.2, %v188_v41  ;;  %vm256_vm7 = vcmp.gt.f32.partialorder %v220_v42, 0.0  ;;  %v200_v51 = vpop.f32.mrf.mxu0  ;;  %v232_v52 = vpop.f32.mrf.mxu1 }
  0xed   :  { %306 = vst [vmem:[%s552_s3 + $0x58] sm:$0xff] %v290_v46  ;;  %v272_v50 = vmul.f32 0.2, %v220_v42  ;;  %vm253_vm8 = vcmp.gt.f32.partialorder %v209_v47, 0.0  ;;  %v269_v53 = vmul.f32 0.2, %v209_v47  ;;  %v201_v57 = vadd.f32 %v483_v16, %v200_v51 }
  0xee   :  { %vm261_vm9 = vcmp.gt.f32.partialorder %v241_v48, 0.0  ;;  %v277_v54 = vmul.f32 0.2, %v241_v48  ;;  %v280_v55 = vsel %vm248_vm6, %v188_v41, %v264_v49  ;;  %v233_v58 = vadd.f32 %v483_v16, %v232_v52  ;;  %v371_v59 = vpop.f32.mrf.mxu0  ;;  %v379_v60 = vpop.f32.mrf.mxu1 }
  0xef   :  { %v288_v56 = vsel %vm256_vm7, %v220_v42, %v272_v50  ;;  %296 = vst [vmem:[%s552_s3 + $0x8] sm:$0xff] %v280_v55  ;;  %v285_v61 = vsel %vm253_vm8, %v209_v47, %v269_v53  ;;  %v212_v63 = vadd.f32 %v371_v59, %v483_v16  ;;  %v244_v0 = vadd.f32 %v379_v60, %v483_v16 }
  0xf0   :  { %304 = vst [vmem:[%s552_s3 + $0x48] sm:$0xff] %v288_v56  ;;  %v293_v62 = vsel %vm261_vm9, %v241_v48, %v277_v54  ;;  %301 = vst [vmem:[%s552_s3 + $0x30] sm:$0xff] %v285_v61  ;;  %vm251_vm10 = vcmp.gt.f32.partialorder %v201_v57, 0.0  ;;  %v267_v1 = vmul.f32 0.2, %v201_v57  ;;  %vm259_vm11 = vcmp.gt.f32.partialorder %v233_v58, 0.0  ;;  %v203_v3 = vpop.f32.mrf.mxu0  ;;  %v235_v4 = vpop.f32.mrf.mxu1 }
  0xf1   :  { %309 = vst [vmem:[%s552_s3 + $0x70] sm:$0xff] %v293_v62  ;;  %v275_v2 = vmul.f32 0.2, %v233_v58  ;;  %vm254_vm12 = vcmp.gt.f32.partialorder %v212_v63, 0.0  ;;  %v270_v5 = vmul.f32 0.2, %v212_v63  ;;  %v204_v9 = vadd.f32 %v483_v16, %v203_v3 }
  0xf2   :  { %vm262_vm13 = vcmp.gt.f32.partialorder %v244_v0, 0.0  ;;  %v278_v6 = vmul.f32 0.2, %v244_v0  ;;  %v283_v7 = vsel %vm251_vm10, %v201_v57, %v267_v1  ;;  %v236_v10 = vadd.f32 %v483_v16, %v235_v4 }
  0xf3   :  { %v291_v8 = vsel %vm259_vm11, %v233_v58, %v275_v2  ;;  %299 = vst [vmem:[%s552_s3 + $0x20] sm:$0xff] %v283_v7  ;;  %v286_v11 = vsel %vm254_vm12, %v212_v63, %v270_v5  ;;  %vm252_vm14 = vcmp.gt.f32.partialorder %v204_v9, 0.0  ;;  %v268_v13 = vmul.f32 0.2, %v204_v9 }
  0xf4   :  { %307 = vst [vmem:[%s552_s3 + $0x60] sm:$0xff] %v291_v8  ;;  %v294_v12 = vsel %vm262_vm13, %v244_v0, %v278_v6  ;;  %302 = vst [vmem:[%s552_s3 + $0x38] sm:$0xff] %v286_v11  ;;  %vm260_vm15 = vcmp.gt.f32.partialorder %v236_v10, 0.0  ;;  %v276_v14 = vmul.f32 0.2, %v236_v10 }
  0xf5   :  { %310 = vst [vmem:[%s552_s3 + $0x78] sm:$0xff] %v294_v12  ;;  %v284_v15 = vsel %vm252_vm14, %v204_v9, %v268_v13 }
  0xf6   :  { %v292_v16 = vsel %vm260_vm15, %v236_v10, %v276_v14  ;;  %300 = vst [vmem:[%s552_s3 + $0x28] sm:$0xff] %v284_v15 }
  0xf7   :  { %308 = vst [vmem:[%s552_s3 + $0x68] sm:$0xff] %v292_v16 }

// kernel: _lambda_.5
= control target key start
LH: loop header
LB: loop body
LE: loop exit
PB: predicated region body
PF: predicated region fallthrough
CT: control target
= control target key end

     0   :  { %s1611_s1 = inlined_call_operand.vmem [shape: bf16[1152,128], index: 1, kind: input, shape index: {}]   ;;  %s1612_s0 = inlined_call_operand.vmem [shape: bf16[32,1152], index: 0, kind: input, shape index: {}]   ;;  %s1613_s2 = inlined_call_operand.vmem [shape: f32[1,128], index: 2, kind: input, shape index: {}]   ;;  %s1614_s3 = inlined_call_operand.vmem [shape: f32[32,128], index: 3, kind: output, shape index: {}]  }
   0x1   :  { %v1208_v0 = vld [vmem:[%s1611_s1 + $0x78] sm:$0xff]   ;;  %v1212_v4 = vld [vmem:[%s1611_s1 + $0x70] sm:$0xff]   ;;  %v1216_v8 = vld [vmem:[%s1611_s1 + $0x68] sm:$0xff]  }
   0x2   :  { %v1209_v1 = vld [vmem:[%s1611_s1 + $0x38] sm:$0xff]   ;;  %1066 = vmatprep.subr.bf16.mxu0 %v1208_v0  ;;  %v1213_v5 = vld [vmem:[%s1611_s1 + $0x30] sm:$0xff]   ;;  %v1217_v9 = vld [vmem:[%s1611_s1 + $0x28] sm:$0xff]  }
   0x3   :  { %v1210_v2 = vld [vmem:[%s1611_s1 + $0xf8] sm:$0xff]   ;;  %1067 = vmatpush3.bf16.msra.mxu0 %v1209_v1  ;;  %v1214_v6 = vld [vmem:[%s1611_s1 + $0xf0] sm:$0xff]   ;;  %v1218_v10 = vld [vmem:[%s1611_s1 + $0xe8] sm:$0xff]  }
   0x4   :  { %v1211_v3 = vld [vmem:[%s1611_s1 + $0xb8] sm:$0xff]   ;;  %1094 = vmatprep.subr.bf16.mxu1 %v1210_v2  ;;  %1068 = vmatprep.subr.bf16.mxu0 %v1212_v4  ;;  %v1215_v7 = vld [vmem:[%s1611_s1 + $0xb0] sm:$0xff]   ;;  %v1219_v11 = vld [vmem:[%s1611_s1 + $0xa8] sm:$0xff]  }
   0x5   :  { %1095 = vmatpush3.bf16.msra.mxu1 %v1211_v3  ;;  %v1220_v12 = vld [vmem:[%s1611_s1 + $0x60] sm:$0xff]   ;;  %v1224_v16 = vld [vmem:[%s1611_s1 + $0x58] sm:$0xff]   ;;  %v1228_v20 = vld [vmem:[%s1611_s1 + $0x50] sm:$0xff]  }
   0x6   :  { %1096 = vmatprep.subr.bf16.mxu1 %v1214_v6  ;;  %v1221_v13 = vld [vmem:[%s1611_s1 + $0x20] sm:$0xff]   ;;  %v1225_v17 = vld [vmem:[%s1611_s1 + $0x18] sm:$0xff]   ;;  %v1229_v21 = vld [vmem:[%s1611_s1 + $0x10] sm:$0xff]  }
   0x7   :  { %1069 = vmatpush3.bf16.msra.mxu0 %v1213_v5  ;;  %v1222_v14 = vld [vmem:[%s1611_s1 + $0xe0] sm:$0xff]   ;;  %v1226_v18 = vld [vmem:[%s1611_s1 + $0xd8] sm:$0xff]   ;;  %v1230_v22 = vld [vmem:[%s1611_s1 + $0xd0] sm:$0xff]  }
   0x8   :  { %1070 = vmatprep.subr.bf16.mxu0 %v1216_v8  ;;  %v1223_v15 = vld [vmem:[%s1611_s1 + $0xa0] sm:$0xff]   ;;  %v1227_v19 = vld [vmem:[%s1611_s1 + $0x98] sm:$0xff]   ;;  %v1231_v23 = vld [vmem:[%s1611_s1 + $0x90] sm:$0xff]  }
   0x9   :  { %1097 = vmatpush3.bf16.msra.mxu1 %v1215_v7  ;;  %v1232_v24 = vld [vmem:[%s1611_s1 + $0x48] sm:$0xff]   ;;  %v1236_v28 = vld [vmem:[%s1611_s1 + $0x40] sm:$0xff]   ;;  %v1243_v34 = vld [vmem:[%s1611_s1 + $0x178] sm:$0xff]  }
   0xa   :  { %1098 = vmatprep.subr.bf16.mxu1 %v1218_v10  ;;  %v1233_v25 = vld [vmem:[%s1611_s1 + $0x8] sm:$0xff]   ;;  %v1237_v29 = vld [vmem:[%s1611_s1] sm:$0xff]   ;;  %v1247_v37 = vld [vmem:[%s1611_s1 + $0x138] sm:$0xff]  }
   0xb   :  { %1071 = vmatpush3.bf16.msra.mxu0 %v1217_v9  ;;  %v1234_v26 = vld [vmem:[%s1611_s1 + $0xc8] sm:$0xff]   ;;  %v1238_v30 = vld [vmem:[%s1611_s1 + $0xc0] sm:$0xff]   ;;  %v1248_v38 = vld [vmem:[%s1611_s1 + $0x1f8] sm:$0xff]  }
   0xc   :  { %1072 = vmatprep.subr.bf16.mxu0 %v1220_v12  ;;  %v1235_v27 = vld [vmem:[%s1611_s1 + $0x88] sm:$0xff]   ;;  %v1239_v31 = vld [vmem:[%s1612_s0] ss:$36 sps:$4 sm:$0xff]   ;;  %v1249_v39 = vld [vmem:[%s1611_s1 + $0x1b8] sm:$0xff]  }
   0xd   :  { %1099 = vmatpush3.bf16.msra.mxu1 %v1219_v11  ;;  %v1241_v32 = vld [vmem:[%s1612_s0 + $0x4] ss:$36 sps:$4 sm:$0xff]   ;;  %v1246_v36 = vld [vmem:[%s1612_s0 + $0xc] ss:$36 sps:$4 sm:$0xff]   ;;  %v1262_v52 = vld [vmem:[%s1611_s1 + $0x158] sm:$0xff]  }
   0xe   :  { %1100 = vmatprep.subr.bf16.mxu1 %v1222_v14  ;;  %v1242_v33 = vld [vmem:[%s1611_s1 + $0x80] sm:$0xff]   ;;  %742 = vmatprep.mubr.bf16.mxu0 %v1241_v32  ;;  %v1244_v35 = vld [vmem:[%s1612_s0 + $0x8] ss:$36 sps:$4 sm:$0xff]   ;;  %v1250_v40 = vld [vmem:[%s1611_s1 + $0x170] sm:$0xff]  }
   0xf   :  { %1073 = vmatpush3.bf16.msra.mxu0 %v1221_v13  ;;  %791 = vmatprep.mubr.bf16.mxu1 %v1246_v36  ;;  %v1251_v41 = vld [vmem:[%s1611_s1 + $0x130] sm:$0xff]   ;;  %v1254_v44 = vld [vmem:[%s1611_s1 + $0x168] sm:$0xff]   ;;  %v1258_v48 = vld [vmem:[%s1611_s1 + $0x160] sm:$0xff]  }
  0x10   :  { %1074 = vmatprep.subr.bf16.mxu0 %v1224_v16  ;;  %v1252_v42 = vld [vmem:[%s1611_s1 + $0x1f0] sm:$0xff]   ;;  %v1255_v45 = vld [vmem:[%s1611_s1 + $0x128] sm:$0xff]   ;;  %v1259_v49 = vld [vmem:[%s1611_s1 + $0x120] sm:$0xff]  }
  0x11   :  { %1101 = vmatpush3.bf16.msra.mxu1 %v1223_v15  ;;  %v1253_v43 = vld [vmem:[%s1611_s1 + $0x1b0] sm:$0xff]   ;;  %v1256_v46 = vld [vmem:[%s1611_s1 + $0x1e8] sm:$0xff]   ;;  %v1260_v50 = vld [vmem:[%s1611_s1 + $0x1e0] sm:$0xff]  }
  0x12   :  { %1102 = vmatprep.subr.bf16.mxu1 %v1226_v18  ;;  %v1257_v47 = vld [vmem:[%s1611_s1 + $0x1a8] sm:$0xff]   ;;  %v1261_v51 = vld [vmem:[%s1611_s1 + $0x1a0] sm:$0xff]   ;;  %v1263_v53 = vld [vmem:[%s1611_s1 + $0x118] sm:$0xff]  }
  0x13   :  { %1075 = vmatpush3.bf16.msra.mxu0 %v1225_v17  ;;  %v1264_v54 = vld [vmem:[%s1612_s0 + $0x4c] ss:$36 sps:$4 sm:$0xff]   ;;  %v1266_v55 = vld [vmem:[%s1611_s1 + $0x1d8] sm:$0xff]   ;;  %v1280_v4 = vld [vmem:[%s1611_s1 + $0x140] sm:$0xff]  }
  0x14   :  { %1076 = vmatprep.subr.bf16.mxu0 %v1228_v20  ;;  %v1267_v56 = vld [vmem:[%s1612_s0 + $0x48] ss:$36 sps:$4 sm:$0xff]   ;;  %v1268_v57 = vld [vmem:[%s1611_s1 + $0x198] sm:$0xff]   ;;  %v1271_v59 = vld [vmem:[%s1611_s1 + $0x150] sm:$0xff]  }
  0x15   :  { %1103 = vmatpush3.bf16.msra.mxu1 %v1227_v19  ;;  %v1269_v58 = vld [vmem:[%s1612_s0 + $0x54] ss:$36 sps:$4 sm:$0xff]   ;;  %v1276_v0 = vld [vmem:[%s1611_s1 + $0x148] sm:$0xff]   ;;  %v1281_v5 = vld [vmem:[%s1611_s1 + $0x100] sm:$0xff]  }
  0x16   :  { %1104 = vmatprep.subr.bf16.mxu1 %v1230_v22  ;;  %v1272_v60 = vld [vmem:[%s1612_s0 + $0x50] ss:$36 sps:$4 sm:$0xff]   ;;  %v1277_v1 = vld [vmem:[%s1611_s1 + $0x108] sm:$0xff]   ;;  %v1282_v6 = vld [vmem:[%s1611_s1 + $0x1c0] sm:$0xff]  }
  0x17   :  { %1077 = vmatpush3.bf16.msra.mxu0 %v1229_v21  ;;  %v1273_v61 = vld [vmem:[%s1611_s1 + $0x110] sm:$0xff]   ;;  %v1278_v2 = vld [vmem:[%s1611_s1 + $0x1c8] sm:$0xff]   ;;  %v1286_v9 = vld [vmem:[%s1611_s1 + $0x180] sm:$0xff]  }
  0x18   :  { %1078 = vmatprep.subr.bf16.mxu0 %v1232_v24  ;;  %v1274_v62 = vld [vmem:[%s1611_s1 + $0x1d0] sm:$0xff]   ;;  %v1279_v3 = vld [vmem:[%s1611_s1 + $0x188] sm:$0xff]   ;;  %v1287_v10 = vld [vmem:[%s1611_s1 + $0x238] sm:$0xff]  }
  0x19   :  { %1105 = vmatpush3.bf16.msra.mxu1 %v1231_v23  ;;  %v1275_v63 = vld [vmem:[%s1611_s1 + $0x190] sm:$0xff]   ;;  %v1288_v11 = vld [vmem:[%s1612_s0 + $0x18] ss:$36 sps:$4 sm:$0xff]   ;;  %v1295_v16 = vld [vmem:[%s1611_s1 + $0x228] sm:$0xff]  }
  0x1a   :  { %1106 = vmatprep.subr.bf16.mxu1 %v1234_v26  ;;  %v1283_v7 = vld [vmem:[%s1612_s0 + $0x10] ss:$36 sps:$4 sm:$0xff]   ;;  %v1290_v12 = vld [vmem:[%s1612_s0 + $0x1c] ss:$36 sps:$4 sm:$0xff]   ;;  %v1296_v17 = vld [vmem:[%s1612_s0 + $0x64] ss:$36 sps:$4 sm:$0xff]  }
  0x1b   :  { %1079 = vmatpush3.bf16.msra.mxu0 %v1233_v25  ;;  %v1285_v8 = vld [vmem:[%s1612_s0 + $0x14] ss:$36 sps:$4 sm:$0xff]   ;;  %v1292_v14 = vld [vmem:[%s1612_s0 + $0x5c] ss:$36 sps:$4 sm:$0xff]   ;;  %v1302_v23 = vld [vmem:[%s1611_s1 + $0x208] sm:$0xff]  }
  0x1c   :  { %1080 = vmatprep.subr.bf16.mxu0 %v1236_v28  ;;  %v1291_v13 = vld [vmem:[%s1611_s1 + $0x230] sm:$0xff]   ;;  %v1294_v15 = vld [vmem:[%s1612_s0 + $0x58] ss:$36 sps:$4 sm:$0xff]   ;;  %v1298_v18 = vld [vmem:[%s1612_s0 + $0x60] ss:$36 sps:$4 sm:$0xff]  }
  0x1d   :  { %1107 = vmatpush3.bf16.msra.mxu1 %v1235_v27  ;;  %v1299_v19 = vld [vmem:[%s1611_s1 + $0x220] sm:$0xff]   ;;  %v1300_v20 = vld [vmem:[%s1611_s1 + $0x218] sm:$0xff]   ;;  %v1301_v22 = vld [vmem:[%s1611_s1 + $0x210] sm:$0xff]  }
  0x1e   :  { %1108 = vmatprep.subr.bf16.mxu1 %v1238_v30  ;;  %v1304_v21 = vld [vmem:[%s1612_s0 + $0x20] ss:$36 sps:$4 sm:$0xff]   ;;  %v1305_v25 = vld [vmem:[%s1612_s0 + $0x68] ss:$36 sps:$4 sm:$0xff]  }
  0x1f   :  { %1081 = vmatpush3.bf16.msra.mxu0 %v1237_v29  ;;  %v1303_v24 = vld [vmem:[%s1611_s1 + $0x200] sm:$0xff]  }
  0x20   :  { %1122 = vmatprep.subr.bf16.mxu0 %v1243_v34 }
  0x21   :  { %1109 = vmatpush3.bf16.msra.mxu1 %v1242_v33 }
  0x22   :  { %743 = vmatmul.mubr.bf16.vlgmr.msra.gmra.mxu0 %v1239_v31  ;;  %1150 = vmatprep.subr.bf16.mxu1 %v1248_v38 }
  0x23   :  { %1123 = vmatpush3.bf16.msra.mxu0 %v1247_v37  ;;  %750 = vmatprep.mubr.bf16.mxu0 %v1264_v54 }
  0x24   :  { %792 = vmatmul.mubr.bf16.vlgmr.msra.gmra.mxu1 %v1244_v35  ;;  %1124 = vmatprep.subr.bf16.mxu0 %v1250_v40 }
  0x25   :  { %1151 = vmatpush3.bf16.msra.mxu1 %v1249_v39  ;;  %799 = vmatprep.mubr.bf16.mxu1 %v1269_v58 }
  0x26   :  { %1152 = vmatprep.subr.bf16.mxu1 %v1252_v42 }
  0x27   :  { %1125 = vmatpush3.bf16.msra.mxu0 %v1251_v41 }
  0x28   :  { %1126 = vmatprep.subr.bf16.mxu0 %v1254_v44 }
  0x29   :  { %1153 = vmatpush3.bf16.msra.mxu1 %v1253_v43 }
  0x2a   :  { %1154 = vmatprep.subr.bf16.mxu1 %v1256_v46  ;;  %751 = vmatmul.mubr.bf16.gmra.mxu0 %v1267_v56 }
  0x2b   :  { %1127 = vmatpush3.bf16.msra.mxu0 %v1255_v45  ;;  %840 = vmatprep.mubr.bf16.mxu0 %v1285_v8 }
  0x2c   :  { %1128 = vmatprep.subr.bf16.mxu0 %v1258_v48  ;;  %800 = vmatmul.mubr.bf16.gmra.mxu1 %v1272_v60 }
  0x2d   :  { %1155 = vmatpush3.bf16.msra.mxu1 %v1257_v47  ;;  %889 = vmatprep.mubr.bf16.mxu1 %v1290_v12 }
  0x2e   :  { %1156 = vmatprep.subr.bf16.mxu1 %v1260_v50 }
  0x2f   :  { %1129 = vmatpush3.bf16.msra.mxu0 %v1259_v49 }
  0x30   :  { %1130 = vmatprep.subr.bf16.mxu0 %v1262_v52 }
  0x31   :  { %1157 = vmatpush3.bf16.msra.mxu1 %v1261_v51 }
  0x32   :  { %1158 = vmatprep.subr.bf16.mxu1 %v1266_v55  ;;  %v975_v55 = vld [vmem:[%s1613_s2] ss:$0 sm:$0xff] }
  0x33   :  { %1131 = vmatpush3.bf16.msra.mxu0 %v1263_v53 }
  0x34   :  { %1132 = vmatprep.subr.bf16.mxu0 %v1271_v59 }
  0x35   :  { %1159 = vmatpush3.bf16.msra.mxu1 %v1268_v57 }
  0x36   :  { %1160 = vmatprep.subr.bf16.mxu1 %v1274_v62 }
  0x37   :  { %1133 = vmatpush3.bf16.msra.mxu0 %v1273_v61 }
  0x38   :  { %1134 = vmatprep.subr.bf16.mxu0 %v1276_v0 }
  0x39   :  { %1161 = vmatpush3.bf16.msra.mxu1 %v1275_v63 }
  0x3a   :  { %1162 = vmatprep.subr.bf16.mxu1 %v1278_v2 }
  0x3b   :  { %1135 = vmatpush3.bf16.msra.mxu0 %v1277_v1 }
  0x3c   :  { %1136 = vmatprep.subr.bf16.mxu0 %v1280_v4 }
  0x3d   :  { %1163 = vmatpush3.bf16.msra.mxu1 %v1279_v3 }
  0x3e   :  { %1164 = vmatprep.subr.bf16.mxu1 %v1282_v6 }
  0x3f   :  { %1137 = vmatpush3.bf16.msra.mxu0 %v1281_v5 }
  0x40   :  { %1188 = vmatprep.subr.bf16.mxu0 %v1287_v10 }
  0x41   :  { %1165 = vmatpush3.bf16.msra.mxu1 %v1286_v9 }
  0x42   :  { %841 = vmatmul.mubr.bf16.vlgmr.msra.gmra.mxu0 %v1283_v7 }
  0x43   :  { %1189 = vmatpush3.bf16.msra.mxu0 %v1287_v10  ;;  %848 = vmatprep.mubr.bf16.mxu0 %v1292_v14 }
  0x44   :  { %890 = vmatmul.mubr.bf16.vlgmr.msra.gmra.mxu1 %v1288_v11  ;;  %1190 = vmatprep.subr.bf16.mxu0 %v1291_v13 }
  0x45   :  { %897 = vmatprep.mubr.bf16.mxu1 %v1296_v17 }
  0x47   :  { %1191 = vmatpush3.bf16.msra.mxu0 %v1291_v13 }
  0x48   :  { %1192 = vmatprep.subr.bf16.mxu0 %v1295_v16 }
  0x4a   :  { %849 = vmatmul.mubr.bf16.gmra.mxu0 %v1294_v15 }
  0x4b   :  { %1193 = vmatpush3.bf16.msra.mxu0 %v1295_v16  ;;  %1204 = vmatprep.mubr.bf16.mxu0 %v1304_v21 }
  0x4c   :  { %898 = vmatmul.mubr.bf16.gmra.mxu1 %v1298_v18  ;;  %1194 = vmatprep.subr.bf16.mxu0 %v1299_v19 }
  0x4f   :  { %1195 = vmatpush3.bf16.msra.mxu0 %v1299_v19 }
  0x50   :  { %1196 = vmatprep.subr.bf16.mxu0 %v1300_v20 }
  0x53   :  { %1197 = vmatpush3.bf16.msra.mxu0 %v1300_v20 }
  0x54   :  { %1198 = vmatprep.subr.bf16.mxu0 %v1301_v22 }
  0x57   :  { %1199 = vmatpush3.bf16.msra.mxu0 %v1301_v22 }
  0x58   :  { %1200 = vmatprep.subr.bf16.mxu0 %v1302_v23 }
  0x5b   :  { %1201 = vmatpush3.bf16.msra.mxu0 %v1302_v23 }
  0x5c   :  { %1202 = vmatprep.subr.bf16.mxu0 %v1303_v24 }
  0x5f   :  { %1203 = vmatpush3.bf16.msra.mxu0 %v1303_v24 }
  0x62   :  { %1205 = vmatmul.mubr.bf16.vlgmr.msra.gmra.mxu0 %v1305_v25 }
  0xe2   :  { %v1082_v26 = vpop.f32.mrf.mxu0 }
  0xe4   :  { %v1110_v27 = vpop.f32.mrf.mxu1  ;;  %v1083_v28 = vpop.f32.mrf.mxu0 }
  0xe5   :  { %v1084_v54 = vadd.f32 %v1083_v28, %v1082_v26 }
  0xe6   :  { %v1111_v29 = vpop.f32.mrf.mxu1  ;;  %v1085_v30 = vpop.f32.mrf.mxu0 }
  0xe7   :  { %v745_v62 = vadd.f32 %v1084_v54, %v975_v55  ;;  %v1112_v63 = vadd.f32 %v1111_v29, %v1110_v27 }
  0xe8   :  { %v1113_v31 = vpop.f32.mrf.mxu1  ;;  %v1086_v32 = vpop.f32.mrf.mxu0 }
  0xe9   :  { %v1087_v61 = vadd.f32 %v1086_v32, %v1085_v30  ;;  %v794_v9 = vadd.f32 %v1112_v63, %v745_v62 }
  0xea   :  { %v1088_v33 = vpop.f32.mrf.mxu0  ;;  %v1114_v34 = vpop.f32.mrf.mxu1 }
  0xeb   :  { %v748_v7 = vadd.f32 %v1087_v61, %v975_v55  ;;  %v1115_v8 = vadd.f32 %v1114_v34, %v1113_v31 }
  0xec   :  { %v1116_v35 = vpop.f32.mrf.mxu1  ;;  %v1089_v36 = vpop.f32.mrf.mxu0 }
  0xed   :  { %v1090_v53 = vadd.f32 %v1089_v36, %v1088_v33  ;;  %v797_v18 = vadd.f32 %v1115_v8, %v748_v7 }
  0xee   :  { %v1117_v37 = vpop.f32.mrf.mxu1  ;;  %v1091_v38 = vpop.f32.mrf.mxu0 }
  0xef   :  { %v753_v58 = vadd.f32 %v1090_v53, %v975_v55  ;;  %v1118_v59 = vadd.f32 %v1117_v37, %v1116_v35 }
  0xf0   :  { %v1119_v39 = vpop.f32.mrf.mxu1  ;;  %v1092_v40 = vpop.f32.mrf.mxu0 }
  0xf1   :  { %v1093_v60 = vadd.f32 %v1092_v40, %v1091_v38  ;;  %v802_v3 = vadd.f32 %v1118_v59, %v753_v58 }
  0xf2   :  { %v1120_v42 = vpop.f32.mrf.mxu1 }
  0xf3   :  { %v756_v4 = vadd.f32 %v1093_v60, %v975_v55  ;;  %v1121_v5 = vadd.f32 %v1120_v42, %v1119_v39 }
  0xf5   :  { %v805_v15 = vadd.f32 %v1121_v5, %v756_v4 }
 0x102   :  { %v1138_v41 = vpop.f32.mrf.mxu0 }
 0x104   :  { %v1139_v43 = vpop.f32.mrf.mxu0  ;;  %v1166_v44 = vpop.f32.mrf.mxu1 }
 0x105   :  { %v1140_v6 = vadd.f32 %v1139_v43, %v1138_v41 }
 0x106   :  { %v1141_v45 = vpop.f32.mrf.mxu0  ;;  %v1167_v46 = vpop.f32.mrf.mxu1 }
 0x107   :  { %v843_v16 = vadd.f32 %v1140_v6, %v794_v9  ;;  %v1168_v17 = vadd.f32 %v1167_v46, %v1166_v44 }
 0x108   :  { %v1142_v47 = vpop.f32.mrf.mxu0  ;;  %v1169_v48 = vpop.f32.mrf.mxu1 }
 0x109   :  { %v1143_v13 = vadd.f32 %v1142_v47, %v1141_v45  ;;  %v892_v26 = vadd.f32 %v1168_v17, %v843_v16 }
 0x10a   :  { %v1144_v49 = vpop.f32.mrf.mxu0  ;;  %v1170_v50 = vpop.f32.mrf.mxu1 }
 0x10b   :  { %v846_v22 = vadd.f32 %v1143_v13, %v797_v18  ;;  %v1171_v23 = vadd.f32 %v1170_v50, %v1169_v48 }
 0x10c   :  { %v1145_v51 = vpop.f32.mrf.mxu0  ;;  %v1172_v52 = vpop.f32.mrf.mxu1 }
 0x10d   :  { %v1146_v0 = vadd.f32 %v1145_v51, %v1144_v49  ;;  %v895_v32 = vadd.f32 %v1171_v23, %v846_v22 }
 0x10e   :  { %v1147_v56 = vpop.f32.mrf.mxu0  ;;  %v1173_v57 = vpop.f32.mrf.mxu1 }
 0x10f   :  { %v851_v10 = vadd.f32 %v1146_v0, %v802_v3  ;;  %v1174_v11 = vadd.f32 %v1173_v57, %v1172_v52 }
 0x110   :  { %v1148_v1 = vpop.f32.mrf.mxu0  ;;  %v1175_v2 = vpop.f32.mrf.mxu1 }
 0x111   :  { %v1149_v12 = vadd.f32 %v1148_v1, %v1147_v56  ;;  %v900_v21 = vadd.f32 %v1174_v11, %v851_v10 }
 0x112   :  { %v1176_v14 = vpop.f32.mrf.mxu1 }
 0x113   :  { %v854_v19 = vadd.f32 %v1149_v12, %v805_v15  ;;  %v1177_v20 = vadd.f32 %v1176_v14, %v1175_v2 }
 0x115   :  { %v903_v30 = vadd.f32 %v1177_v20, %v854_v19 }
 0x122   :  { %v1206_v24 = vpop.f32.mrf.mxu0 }
 0x123   :  { %v949_v25 = vadd.f32 %v1206_v24, %v900_v21 }
 0x124   :  { %v940_v27 = vpop.f32.mrf.mxu0 }
 0x125   :  { %vm957_vm0 = vcmp.gt.f32.partialorder %v949_v25, 0.0  ;;  %v961_v28 = vmul.f32 0.2, %v949_v25  ;;  %v941_v29 = vadd.f32 %v940_v27, %v892_v26 }
 0x126   :  { %v1207_v31 = vpop.f32.mrf.mxu0 }
 0x127   :  { %v965_v33 = vsel %vm957_vm0, %v949_v25, %v961_v28  ;;  %vm955_vm1 = vcmp.gt.f32.partialorder %v941_v29, 0.0  ;;  %v959_v34 = vmul.f32 0.2, %v941_v29  ;;  %v952_v35 = vadd.f32 %v1207_v31, %v903_v30 }
 0x128   :  { %969 = vst [vmem:[%s1614_s3 + $0x10] sm:$0xff] %v965_v33  ;;  %v943_v36 = vpop.f32.mrf.mxu0 }
 0x129   :  { %v963_v37 = vsel %vm955_vm1, %v941_v29, %v959_v34  ;;  %vm958_vm2 = vcmp.gt.f32.partialorder %v952_v35, 0.0  ;;  %v962_v38 = vmul.f32 0.2, %v952_v35  ;;  %v944_v39 = vadd.f32 %v943_v36, %v895_v32 }
 0x12a   :  { %967 = vst [vmem:[%s1614_s3] sm:$0xff] %v963_v37 }
 0x12b   :  { %v966_v40 = vsel %vm958_vm2, %v952_v35, %v962_v38  ;;  %vm956_vm3 = vcmp.gt.f32.partialorder %v944_v39, 0.0  ;;  %v960_v41 = vmul.f32 0.2, %v944_v39 }
 0x12c   :  { %970 = vst [vmem:[%s1614_s3 + $0x18] sm:$0xff] %v966_v40 }
 0x12d   :  { %v964_v42 = vsel %vm956_vm3, %v944_v39, %v960_v41 }
 0x12e   :  { %968 = vst [vmem:[%s1614_s3 + $0x8] sm:$0xff] %v964_v42 }

// kernel: _lambda_.7
= control target key start
LH: loop header
LB: loop body
LE: loop exit
PB: predicated region body
PF: predicated region fallthrough
CT: control target
= control target key end

     0   :  { %s635_s1 = inlined_call_operand.vmem [shape: bf16[512,128], index: 1, kind: input, shape index: {}]   ;;  %s636_s0 = inlined_call_operand.vmem [shape: bf16[8,512], index: 0, kind: input, shape index: {}]   ;;  %s637_s2 = inlined_call_operand.vmem [shape: f32[1,128], index: 2, kind: input, shape index: {}]   ;;  %s638_s3 = inlined_call_operand.vmem [shape: f32[8,128], index: 3, kind: output, shape index: {}]  }
   0x1   :  { %v467_v0 = vld [vmem:[%s635_s1 + $0x78] sm:$0xff]   ;;  %v471_v4 = vld [vmem:[%s635_s1 + $0x70] sm:$0xff]   ;;  %v475_v8 = vld [vmem:[%s635_s1 + $0x68] sm:$0xff]  }
   0x2   :  { %v468_v1 = vld [vmem:[%s635_s1 + $0xf8] sm:$0xff]   ;;  %423 = vmatprep.subr.bf16.mxu0 %v467_v0  ;;  %v472_v5 = vld [vmem:[%s635_s1 + $0xf0] sm:$0xff]   ;;  %v476_v9 = vld [vmem:[%s635_s1 + $0xe8] sm:$0xff]  }
   0x3   :  { %v469_v2 = vld [vmem:[%s635_s1 + $0x38] sm:$0xff]   ;;  %445 = vmatprep.subr.bf16.mxu1 %v468_v1  ;;  %v473_v6 = vld [vmem:[%s635_s1 + $0x30] sm:$0xff]   ;;  %v477_v10 = vld [vmem:[%s635_s1 + $0x28] sm:$0xff]  }
   0x4   :  { %v470_v3 = vld [vmem:[%s635_s1 + $0xb8] sm:$0xff]   ;;  %424 = vmatpush3.bf16.msra.mxu0 %v469_v2  ;;  %v474_v7 = vld [vmem:[%s635_s1 + $0xb0] sm:$0xff]   ;;  %v478_v11 = vld [vmem:[%s635_s1 + $0xa8] sm:$0xff]  }
   0x5   :  { %446 = vmatpush3.bf16.msra.mxu1 %v470_v3  ;;  %425 = vmatprep.subr.bf16.mxu0 %v471_v4  ;;  %v479_v12 = vld [vmem:[%s635_s1 + $0x60] sm:$0xff]   ;;  %v483_v16 = vld [vmem:[%s635_s1 + $0x58] sm:$0xff]   ;;  %v487_v20 = vld [vmem:[%s635_s1 + $0x50] sm:$0xff]  }
   0x6   :  { %447 = vmatprep.subr.bf16.mxu1 %v472_v5  ;;  %v480_v13 = vld [vmem:[%s635_s1 + $0xe0] sm:$0xff]   ;;  %v484_v17 = vld [vmem:[%s635_s1 + $0xd8] sm:$0xff]   ;;  %v488_v21 = vld [vmem:[%s635_s1 + $0xd0] sm:$0xff]  }
   0x7   :  { %v481_v14 = vld [vmem:[%s635_s1 + $0x20] sm:$0xff]   ;;  %v485_v18 = vld [vmem:[%s635_s1 + $0x18] sm:$0xff]   ;;  %v489_v22 = vld [vmem:[%s635_s1 + $0x10] sm:$0xff]  }
   0x8   :  { %426 = vmatpush3.bf16.msra.mxu0 %v473_v6  ;;  %v482_v15 = vld [vmem:[%s635_s1 + $0xa0] sm:$0xff]   ;;  %v486_v19 = vld [vmem:[%s635_s1 + $0x98] sm:$0xff]   ;;  %v490_v23 = vld [vmem:[%s635_s1 + $0x90] sm:$0xff]  }
   0x9   :  { %448 = vmatpush3.bf16.msra.mxu1 %v474_v7  ;;  %427 = vmatprep.subr.bf16.mxu0 %v475_v8  ;;  %v491_v24 = vld [vmem:[%s635_s1 + $0x48] sm:$0xff]   ;;  %v495_v28 = vld [vmem:[%s635_s1 + $0x40] sm:$0xff]  }
   0xa   :  { %449 = vmatprep.subr.bf16.mxu1 %v476_v9  ;;  %v492_v25 = vld [vmem:[%s635_s1 + $0xc8] sm:$0xff]   ;;  %v496_v29 = vld [vmem:[%s635_s1 + $0xc0] sm:$0xff]  }
   0xb   :  { %v493_v26 = vld [vmem:[%s635_s1 + $0x8] sm:$0xff]   ;;  %v497_v30 = vld [vmem:[%s635_s1] sm:$0xff]  }
   0xc   :  { %428 = vmatpush3.bf16.msra.mxu0 %v477_v10  ;;  %v494_v27 = vld [vmem:[%s635_s1 + $0x88] sm:$0xff]   ;;  %v498_v31 = vld [vmem:[%s635_s1 + $0x80] sm:$0xff]  }
   0xd   :  { %450 = vmatpush3.bf16.msra.mxu1 %v478_v11  ;;  %429 = vmatprep.subr.bf16.mxu0 %v479_v12  ;;  %v15_v32 = vld [vmem:[%s636_s0] sm:$0xff]  ;;  %v16_v33 = vld [vmem:[%s636_s0 + $0x8] sm:$0xff] }
   0xe   :  { %451 = vmatprep.subr.bf16.mxu1 %v480_v13  ;;  %v386_v34 = vcombine.low %v15_v32, %v15_v32  ;;  %v387_v35 = vcombine.high %v15_v32, %v15_v32  ;;  %v388_v36 = vcombine.low %v16_v33, %v16_v33  ;;  %v389_v37 = vcombine.high %v16_v33, %v16_v33  ;;  %v385_v40 = vld [vmem:[%s637_s2] ss:$0 sm:$0xff] }
  0x10   :  { %430 = vmatpush3.bf16.msra.mxu0 %v481_v14  ;;  %326 = vmatprep.mubr.bf16.mxu0 %v387_v35 }
  0x11   :  { %452 = vmatpush3.bf16.msra.mxu1 %v482_v15  ;;  %431 = vmatprep.subr.bf16.mxu0 %v483_v16 }
  0x12   :  { %453 = vmatprep.subr.bf16.mxu1 %v484_v17  ;;  %366 = vmatprep.mubr.bf16.mxu1 %v389_v37 }
  0x14   :  { %432 = vmatpush3.bf16.msra.mxu0 %v485_v18 }
  0x15   :  { %454 = vmatpush3.bf16.msra.mxu1 %v486_v19  ;;  %433 = vmatprep.subr.bf16.mxu0 %v487_v20 }
  0x16   :  { %455 = vmatprep.subr.bf16.mxu1 %v488_v21 }
  0x18   :  { %434 = vmatpush3.bf16.msra.mxu0 %v489_v22 }
  0x19   :  { %456 = vmatpush3.bf16.msra.mxu1 %v490_v23  ;;  %435 = vmatprep.subr.bf16.mxu0 %v491_v24 }
  0x1a   :  { %457 = vmatprep.subr.bf16.mxu1 %v492_v25 }
  0x1c   :  { %436 = vmatpush3.bf16.msra.mxu0 %v493_v26 }
  0x1d   :  { %458 = vmatpush3.bf16.msra.mxu1 %v494_v27  ;;  %437 = vmatprep.subr.bf16.mxu0 %v495_v28 }
  0x1e   :  { %459 = vmatprep.subr.bf16.mxu1 %v496_v29 }
  0x20   :  { %438 = vmatpush3.bf16.msra.mxu0 %v497_v30 }
  0x21   :  { %460 = vmatpush3.bf16.msra.mxu1 %v498_v31 }
  0x23   :  { %327 = vmatmul.mubr.bf16.vlgmr.msra.gmra.mxu0 %v386_v34 }
  0x24   :  { %367 = vmatmul.mubr.bf16.vlgmr.msra.gmra.mxu1 %v388_v36 }
  0xe3   :  { %v439_v38 = vpop.f32.mrf.mxu0 }
  0xe4   :  { %v461_v39 = vpop.f32.mrf.mxu1 }
  0xe5   :  { %v440_v41 = vpop.f32.mrf.mxu0 }
  0xe6   :  { %v462_v42 = vpop.f32.mrf.mxu1  ;;  %v441_v43 = vadd.f32 %v440_v41, %v439_v38 }
  0xe7   :  { %v442_v44 = vpop.f32.mrf.mxu0  ;;  %v463_v47 = vadd.f32 %v462_v42, %v461_v39 }
  0xe8   :  { %v464_v45 = vpop.f32.mrf.mxu1  ;;  %v329_v46 = vadd.f32 %v441_v43, %v385_v40 }
  0xe9   :  { %v443_v48 = vpop.f32.mrf.mxu0 }
  0xea   :  { %v465_v49 = vpop.f32.mrf.mxu1  ;;  %v369_v50 = vadd.f32 %v463_v47, %v329_v46 }
  0xec   :  { %v422_v51 = vmul.f32 -1.442695, %v369_v50 }
  0xee   :  { %503 = vpow2.f32 %v422_v51 }
  0xfb   :  { %v504_v52 = vpop.eup %503 }
  0xfc   :  { %v377_v53 = vadd.f32 1.0, %v504_v52 }
  0xfe   :  { %505 = vrcp.f32 %v377_v53 }
 0x10b   :  { %v506_v54 = vpop.eup %505 }
 0x10c   :  { %380 = vst [vmem:[%s638_s3] sm:$0xff] %v506_v54 }

// kernel: _lambda_.6
= control target key start
LH: loop header
LB: loop body
LE: loop exit
PB: predicated region body
PF: predicated region fallthrough
CT: control target
= control target key end

     0   :  { %vm1126_vm0 = vmmov 0   ;;  %s1384_s1 = inlined_call_operand.vmem [shape: bf16[1152,128], index: 1, kind: input, shape index: {}]   ;;  %s1385_s0 = inlined_call_operand.vmem [shape: bf16[8,1152], index: 0, kind: input, shape index: {}]   ;;  %s1386_s2 = inlined_call_operand.vmem [shape: f32[1,128], index: 2, kind: input, shape index: {}]   ;;  %s1387_s3 = inlined_call_operand.vmem [shape: f32[8,128], index: 3, kind: output, shape index: {}]  }
   0x1   :  { %v1044_v0 = vld [vmem:[%s1384_s1 + $0x78] sm:$0xff]   ;;  %v1048_v4 = vld [vmem:[%s1384_s1 + $0x70] sm:$0xff]   ;;  %v1052_v8 = vld [vmem:[%s1384_s1 + $0x68] sm:$0xff]  }
   0x2   :  { %v1045_v1 = vld [vmem:[%s1384_s1 + $0x38] sm:$0xff]   ;;  %925 = vmatprep.subr.bf16.mxu0 %v1044_v0  ;;  %v1049_v5 = vld [vmem:[%s1384_s1 + $0x30] sm:$0xff]   ;;  %v1053_v9 = vld [vmem:[%s1384_s1 + $0x28] sm:$0xff]  }
   0x3   :  { %v1046_v2 = vld [vmem:[%s1384_s1 + $0xf8] sm:$0xff]   ;;  %926 = vmatpush3.bf16.msra.mxu0 %v1045_v1  ;;  %v1050_v6 = vld [vmem:[%s1384_s1 + $0xf0] sm:$0xff]   ;;  %v1054_v10 = vld [vmem:[%s1384_s1 + $0xe8] sm:$0xff]  }
   0x4   :  { %v1047_v3 = vld [vmem:[%s1384_s1 + $0xb8] sm:$0xff]   ;;  %947 = vmatprep.subr.bf16.mxu1 %v1046_v2  ;;  %927 = vmatprep.subr.bf16.mxu0 %v1048_v4  ;;  %v1051_v7 = vld [vmem:[%s1384_s1 + $0xb0] sm:$0xff]   ;;  %v1055_v11 = vld [vmem:[%s1384_s1 + $0xa8] sm:$0xff]  }
   0x5   :  { %948 = vmatpush3.bf16.msra.mxu1 %v1047_v3  ;;  %v1056_v12 = vld [vmem:[%s1384_s1 + $0x60] sm:$0xff]   ;;  %v1060_v16 = vld [vmem:[%s1384_s1 + $0x58] sm:$0xff]   ;;  %v1064_v20 = vld [vmem:[%s1384_s1 + $0x50] sm:$0xff]  }
   0x6   :  { %949 = vmatprep.subr.bf16.mxu1 %v1050_v6  ;;  %v1057_v13 = vld [vmem:[%s1384_s1 + $0x20] sm:$0xff]   ;;  %v1061_v17 = vld [vmem:[%s1384_s1 + $0x18] sm:$0xff]   ;;  %v1065_v21 = vld [vmem:[%s1384_s1 + $0x10] sm:$0xff]  }
   0x7   :  { %928 = vmatpush3.bf16.msra.mxu0 %v1049_v5  ;;  %v1058_v14 = vld [vmem:[%s1384_s1 + $0xe0] sm:$0xff]   ;;  %v1062_v18 = vld [vmem:[%s1384_s1 + $0xd8] sm:$0xff]   ;;  %v1066_v22 = vld [vmem:[%s1384_s1 + $0xd0] sm:$0xff]  }
   0x8   :  { %929 = vmatprep.subr.bf16.mxu0 %v1052_v8  ;;  %v1059_v15 = vld [vmem:[%s1384_s1 + $0xa0] sm:$0xff]   ;;  %v1063_v19 = vld [vmem:[%s1384_s1 + $0x98] sm:$0xff]   ;;  %v1067_v23 = vld [vmem:[%s1384_s1 + $0x90] sm:$0xff]  }
   0x9   :  { %950 = vmatpush3.bf16.msra.mxu1 %v1051_v7  ;;  %v1068_v24 = vld [vmem:[%s1384_s1 + $0x48] sm:$0xff]   ;;  %v1072_v28 = vld [vmem:[%s1384_s1 + $0x40] sm:$0xff]   ;;  %v1078_v35 = vld [vmem:[%s1384_s1 + $0x178] sm:$0xff]  }
   0xa   :  { %951 = vmatprep.subr.bf16.mxu1 %v1054_v10  ;;  %v1069_v25 = vld [vmem:[%s1384_s1 + $0x8] sm:$0xff]   ;;  %v1073_v29 = vld [vmem:[%s1384_s1] sm:$0xff]   ;;  %v1081_v39 = vld [vmem:[%s1384_s1 + $0x138] sm:$0xff]  }
   0xb   :  { %930 = vmatpush3.bf16.msra.mxu0 %v1053_v9  ;;  %v1070_v26 = vld [vmem:[%s1384_s1 + $0xc8] sm:$0xff]   ;;  %v1074_v30 = vld [vmem:[%s1384_s1 + $0xc0] sm:$0xff]   ;;  %v1082_v40 = vld [vmem:[%s1384_s1 + $0x1f8] sm:$0xff]   ;;  %v1125_v9 = vmov 0.0  }
   0xc   :  { %931 = vmatprep.subr.bf16.mxu0 %v1056_v12  ;;  %v1071_v27 = vld [vmem:[%s1384_s1 + $0x88] sm:$0xff]   ;;  %v15_v31 = vld [vmem:[%s1385_s0] sm:$0xff]  ;;  %v1083_v41 = vld [vmem:[%s1384_s1 + $0x1b8] sm:$0xff]  }
   0xd   :  { %952 = vmatpush3.bf16.msra.mxu1 %v1055_v11  ;;  %v844_v32 = vcombine.low %v15_v31, %v15_v31  ;;  %v845_v33 = vcombine.high %v15_v31, %v15_v31  ;;  %v1077_v34 = vld [vmem:[%s1384_s1 + $0x80] sm:$0xff]   ;;  %v16_v36 = vld [vmem:[%s1385_s0 + $0x8] sm:$0xff]  ;;  %v1084_v42 = vld [vmem:[%s1384_s1 + $0x170] sm:$0xff]  }
   0xe   :  { %953 = vmatprep.subr.bf16.mxu1 %v1058_v14  ;;  %v846_v37 = vcombine.low %v16_v36, %v16_v36  ;;  %v847_v38 = vcombine.high %v16_v36, %v16_v36  ;;  %v1085_v43 = vld [vmem:[%s1384_s1 + $0x130] sm:$0xff]   ;;  %v1088_v46 = vld [vmem:[%s1384_s1 + $0x168] sm:$0xff]   ;;  %v1092_v50 = vld [vmem:[%s1384_s1 + $0x160] sm:$0xff]  }
   0xf   :  { %932 = vmatpush3.bf16.msra.mxu0 %v1057_v13  ;;  %667 = vmatprep.mubr.bf16.mxu0 %v845_v33  ;;  %v1086_v44 = vld [vmem:[%s1384_s1 + $0x1f0] sm:$0xff]   ;;  %v1089_v47 = vld [vmem:[%s1384_s1 + $0x128] sm:$0xff]   ;;  %v1093_v51 = vld [vmem:[%s1384_s1 + $0x120] sm:$0xff]  }
  0x10   :  { %933 = vmatprep.subr.bf16.mxu0 %v1060_v16  ;;  %707 = vmatprep.mubr.bf16.mxu1 %v847_v38  ;;  %v1087_v45 = vld [vmem:[%s1384_s1 + $0x1b0] sm:$0xff]   ;;  %v1090_v48 = vld [vmem:[%s1384_s1 + $0x1e8] sm:$0xff]   ;;  %v1094_v52 = vld [vmem:[%s1384_s1 + $0x1e0] sm:$0xff]  }
  0x11   :  { %954 = vmatpush3.bf16.msra.mxu1 %v1059_v15  ;;  %v1091_v49 = vld [vmem:[%s1384_s1 + $0x1a8] sm:$0xff]   ;;  %v1095_v53 = vld [vmem:[%s1384_s1 + $0x1a0] sm:$0xff]   ;;  %v1096_v54 = vld [vmem:[%s1384_s1 + $0x158] sm:$0xff]  }
  0x12   :  { %955 = vmatprep.subr.bf16.mxu1 %v1062_v18  ;;  %v1097_v55 = vld [vmem:[%s1384_s1 + $0x118] sm:$0xff]   ;;  %v1100_v58 = vld [vmem:[%s1384_s1 + $0x150] sm:$0xff]   ;;  %v1104_v62 = vld [vmem:[%s1384_s1 + $0x148] sm:$0xff]  }
  0x13   :  { %934 = vmatpush3.bf16.msra.mxu0 %v1061_v17  ;;  %v1098_v56 = vld [vmem:[%s1384_s1 + $0x1d8] sm:$0xff]   ;;  %v1101_v59 = vld [vmem:[%s1384_s1 + $0x110] sm:$0xff]   ;;  %v1105_v63 = vld [vmem:[%s1384_s1 + $0x108] sm:$0xff]  }
  0x14   :  { %935 = vmatprep.subr.bf16.mxu0 %v1064_v20  ;;  %v1099_v57 = vld [vmem:[%s1384_s1 + $0x198] sm:$0xff]   ;;  %v1102_v60 = vld [vmem:[%s1384_s1 + $0x1d0] sm:$0xff]   ;;  %v1106_v0 = vld [vmem:[%s1384_s1 + $0x1c8] sm:$0xff]  }
  0x15   :  { %956 = vmatpush3.bf16.msra.mxu1 %v1063_v19  ;;  %v1103_v61 = vld [vmem:[%s1384_s1 + $0x190] sm:$0xff]   ;;  %v1107_v1 = vld [vmem:[%s1384_s1 + $0x188] sm:$0xff]   ;;  %v1108_v2 = vld [vmem:[%s1384_s1 + $0x140] sm:$0xff]  }
  0x16   :  { %957 = vmatprep.subr.bf16.mxu1 %v1066_v22  ;;  %v1109_v3 = vld [vmem:[%s1384_s1 + $0x100] sm:$0xff]   ;;  %v17_v5 = vld [vmem:[%s1385_s0 + $0x10] sm:$0xff]  ;;  %v18_v10 = vld [vmem:[%s1385_s0 + $0x18] sm:$0xff] }
  0x17   :  { %936 = vmatpush3.bf16.msra.mxu0 %v1065_v21  ;;  %v1110_v4 = vld [vmem:[%s1384_s1 + $0x1c0] sm:$0xff]   ;;  %v848_v6 = vcombine.low %v17_v5, %v17_v5  ;;  %v849_v7 = vcombine.high %v17_v5, %v17_v5  ;;  %v850_v11 = vcombine.low %v18_v10, %v18_v10  ;;  %v851_v12 = vcombine.high %v18_v10, %v18_v10  ;;  %v1116_v13 = vld [vmem:[%s1384_s1 + $0x238] sm:$0xff]   ;;  %v1117_v14 = vld [vmem:[%s1384_s1 + $0x230] sm:$0xff]  }
  0x18   :  { %937 = vmatprep.subr.bf16.mxu0 %v1068_v24  ;;  %v1113_v8 = vld [vmem:[%s1384_s1 + $0x180] sm:$0xff]   ;;  %v1118_v15 = vld [vmem:[%s1384_s1 + $0x228] sm:$0xff]   ;;  %v1120_v17 = vld [vmem:[%s1384_s1 + $0x218] sm:$0xff]  }
  0x19   :  { %958 = vmatpush3.bf16.msra.mxu1 %v1067_v23  ;;  %v1119_v16 = vld [vmem:[%s1384_s1 + $0x220] sm:$0xff]   ;;  %v1121_v18 = vld [vmem:[%s1384_s1 + $0x210] sm:$0xff]   ;;  %v1122_v19 = vld [vmem:[%s1384_s1 + $0x208] sm:$0xff]  }
  0x1a   :  { %959 = vmatprep.subr.bf16.mxu1 %v1070_v26  ;;  %v1123_v20 = vld [vmem:[%s1384_s1 + $0x200] sm:$0xff]  }
  0x1b   :  { %938 = vmatpush3.bf16.msra.mxu0 %v1069_v25  ;;  %v1124_v21 = vld [vmem:[%s1385_s0 + $0x20] ss:$0 sps:$4 sm:$0xff]  }
  0x1c   :  { %939 = vmatprep.subr.bf16.mxu0 %v1072_v28 }
  0x1d   :  { %960 = vmatpush3.bf16.msra.mxu1 %v1071_v27 }
  0x1e   :  { %961 = vmatprep.subr.bf16.mxu1 %v1074_v30 }
  0x1f   :  { %940 = vmatpush3.bf16.msra.mxu0 %v1073_v29 }
  0x20   :  { %969 = vmatprep.subr.bf16.mxu0 %v1078_v35 }
  0x21   :  { %962 = vmatpush3.bf16.msra.mxu1 %v1077_v34 }
  0x22   :  { %668 = vmatmul.mubr.bf16.vlgmr.msra.gmra.mxu0 %v844_v32  ;;  %991 = vmatprep.subr.bf16.mxu1 %v1082_v40 }
  0x23   :  { %970 = vmatpush3.bf16.msra.mxu0 %v1081_v39  ;;  %747 = vmatprep.mubr.bf16.mxu0 %v849_v7  ;;  %v843_v39 = vld [vmem:[%s1386_s2] ss:$0 sm:$0xff] }
  0x24   :  { %708 = vmatmul.mubr.bf16.vlgmr.msra.gmra.mxu1 %v846_v37  ;;  %971 = vmatprep.subr.bf16.mxu0 %v1084_v42 }
  0x25   :  { %992 = vmatpush3.bf16.msra.mxu1 %v1083_v41  ;;  %787 = vmatprep.mubr.bf16.mxu1 %v851_v12 }
  0x26   :  { %993 = vmatprep.subr.bf16.mxu1 %v1086_v44 }
  0x27   :  { %972 = vmatpush3.bf16.msra.mxu0 %v1085_v43 }
  0x28   :  { %973 = vmatprep.subr.bf16.mxu0 %v1088_v46 }
  0x29   :  { %994 = vmatpush3.bf16.msra.mxu1 %v1087_v45 }
  0x2a   :  { %995 = vmatprep.subr.bf16.mxu1 %v1090_v48 }
  0x2b   :  { %974 = vmatpush3.bf16.msra.mxu0 %v1089_v47 }
  0x2c   :  { %975 = vmatprep.subr.bf16.mxu0 %v1092_v50 }
  0x2d   :  { %996 = vmatpush3.bf16.msra.mxu1 %v1091_v49 }
  0x2e   :  { %997 = vmatprep.subr.bf16.mxu1 %v1094_v52 }
  0x2f   :  { %976 = vmatpush3.bf16.msra.mxu0 %v1093_v51 }
  0x30   :  { %977 = vmatprep.subr.bf16.mxu0 %v1096_v54 }
  0x31   :  { %998 = vmatpush3.bf16.msra.mxu1 %v1095_v53 }
  0x32   :  { %999 = vmatprep.subr.bf16.mxu1 %v1098_v56 }
  0x33   :  { %978 = vmatpush3.bf16.msra.mxu0 %v1097_v55 }
  0x34   :  { %979 = vmatprep.subr.bf16.mxu0 %v1100_v58 }
  0x35   :  { %1000 = vmatpush3.bf16.msra.mxu1 %v1099_v57 }
  0x36   :  { %1001 = vmatprep.subr.bf16.mxu1 %v1102_v60 }
  0x37   :  { %980 = vmatpush3.bf16.msra.mxu0 %v1101_v59 }
  0x38   :  { %981 = vmatprep.subr.bf16.mxu0 %v1104_v62 }
  0x39   :  { %1002 = vmatpush3.bf16.msra.mxu1 %v1103_v61 }
  0x3a   :  { %1003 = vmatprep.subr.bf16.mxu1 %v1106_v0 }
  0x3b   :  { %982 = vmatpush3.bf16.msra.mxu0 %v1105_v63 }
  0x3c   :  { %983 = vmatprep.subr.bf16.mxu0 %v1108_v2 }
  0x3d   :  { %1004 = vmatpush3.bf16.msra.mxu1 %v1107_v1 }
  0x3e   :  { %1005 = vmatprep.subr.bf16.mxu1 %v1110_v4 }
  0x3f   :  { %984 = vmatpush3.bf16.msra.mxu0 %v1109_v3 }
  0x40   :  { %1022 = vmatprep.subr.bf16.mxu0 %v1125_v9 }
  0x41   :  { %1006 = vmatpush3.bf16.msra.mxu1 %v1113_v8 }
  0x42   :  { %748 = vmatmul.mubr.bf16.vlgmr.msra.gmra.mxu0 %v848_v6 }
  0x43   :  { %1023 = vmatpush3.bf16.msra.mxu0 %v1116_v13  ;;  %1038 = vmatprep.mubr.msk.bf16.mxu0 %vm1126_vm0, %v1125_v9 }
  0x44   :  { %788 = vmatmul.mubr.bf16.vlgmr.msra.gmra.mxu1 %v850_v11  ;;  %1024 = vmatprep.subr.bf16.mxu0 %v1125_v9 }
  0x47   :  { %1025 = vmatpush3.bf16.msra.mxu0 %v1117_v14 }
  0x48   :  { %1026 = vmatprep.subr.bf16.mxu0 %v1125_v9 }
  0x4b   :  { %1027 = vmatpush3.bf16.msra.mxu0 %v1118_v15 }
  0x4c   :  { %1028 = vmatprep.subr.bf16.mxu0 %v1125_v9 }
  0x4f   :  { %1029 = vmatpush3.bf16.msra.mxu0 %v1119_v16 }
  0x50   :  { %1030 = vmatprep.subr.bf16.mxu0 %v1125_v9 }
  0x53   :  { %1031 = vmatpush3.bf16.msra.mxu0 %v1120_v17 }
  0x54   :  { %1032 = vmatprep.subr.bf16.mxu0 %v1125_v9 }
  0x57   :  { %1033 = vmatpush3.bf16.msra.mxu0 %v1121_v18 }
  0x58   :  { %1034 = vmatprep.subr.bf16.mxu0 %v1125_v9 }
  0x5b   :  { %1035 = vmatpush3.bf16.msra.mxu0 %v1122_v19 }
  0x5c   :  { %1036 = vmatprep.subr.bf16.mxu0 %v1125_v9 }
  0x5f   :  { %1037 = vmatpush3.bf16.msra.mxu0 %v1123_v20 }
  0x62   :  { %1039 = vmatmul.mubr.bf16.vlgmr.msra.gmra.mxu0 %v1124_v21 }
  0xe2   :  { %v941_v22 = vpop.f32.mrf.mxu0 }
  0xe4   :  { %v942_v23 = vpop.f32.mrf.mxu0  ;;  %v963_v24 = vpop.f32.mrf.mxu1 }
  0xe5   :  { %v943_v38 = vadd.f32 %v942_v23, %v941_v22 }
  0xe6   :  { %v944_v25 = vpop.f32.mrf.mxu0  ;;  %v964_v26 = vpop.f32.mrf.mxu1 }
  0xe7   :  { %v670_v40 = vadd.f32 %v943_v38, %v843_v39  ;;  %v965_v41 = vadd.f32 %v964_v26, %v963_v24 }
  0xe8   :  { %v945_v27 = vpop.f32.mrf.mxu0  ;;  %v966_v28 = vpop.f32.mrf.mxu1 }
  0xe9   :  { %v710_v43 = vadd.f32 %v965_v41, %v670_v40 }
  0xea   :  { %v967_v29 = vpop.f32.mrf.mxu1 }
 0x102   :  { %v985_v30 = vpop.f32.mrf.mxu0 }
 0x104   :  { %v986_v31 = vpop.f32.mrf.mxu0  ;;  %v1007_v32 = vpop.f32.mrf.mxu1 }
 0x105   :  { %v987_v42 = vadd.f32 %v986_v31, %v985_v30 }
 0x106   :  { %v988_v33 = vpop.f32.mrf.mxu0  ;;  %v1008_v34 = vpop.f32.mrf.mxu1 }
 0x107   :  { %v750_v44 = vadd.f32 %v987_v42, %v710_v43  ;;  %v1009_v45 = vadd.f32 %v1008_v34, %v1007_v32 }
 0x108   :  { %v989_v35 = vpop.f32.mrf.mxu0  ;;  %v1010_v36 = vpop.f32.mrf.mxu1 }
 0x109   :  { %v790_v46 = vadd.f32 %v1009_v45, %v750_v44 }
 0x10a   :  { %v1011_v37 = vpop.f32.mrf.mxu1 }
 0x122   :  { %v829_v47 = vpop.f32.mrf.mxu0 }
 0x123   :  { %v830_v48 = vadd.f32 %v829_v47, %v790_v46 }
 0x124   :  { %v1040_v49 = vpop.f32.mrf.mxu0 }
 0x125   :  { %vm835_vm1 = vcmp.gt.f32.partialorder %v830_v48, 0.0  ;;  %v836_v50 = vmul.f32 0.2, %v830_v48 }
 0x126   :  { %v832_v51 = vpop.f32.mrf.mxu0 }
 0x127   :  { %v837_v52 = vsel %vm835_vm1, %v830_v48, %v836_v50 }
 0x128   :  { %838 = vst [vmem:[%s1387_s3] sm:$0xff] %v837_v52  ;;  %v1041_v53 = vpop.f32.mrf.mxu0 }

</bundles_post_ra>
